<compile_context>
chip_gen: v5e
topology: v5e:2x2
jax: 0.10.0
libtpu: 0.0.40
codegen_flags: <defaults>
</compile_context>

<pallas_src>
import jax
import jax.numpy as jnp
import numpy as np
from jax.experimental import pallas as pl
from jax.experimental.pallas import tpu as pltpu


def _residual_kernel(x_ref, w1_ref, b1_ref, w2_ref, b2_ref, o_ref):
    x = x_ref[...]                                                    # (tm, H) f32

    # lin1: bf16 MXU operands, f32 accumulate; bias + swish in f32.
    h = jnp.dot(x.astype(jnp.bfloat16), w1_ref[...],
                preferred_element_type=jnp.float32) + b1_ref[...]
    h = h * pl.reciprocal(1.0 + jnp.exp(-h), approx=True)            # swish (EUP exp + vrcp)

    # lin2 + swish.
    g = jnp.dot(h.astype(jnp.bfloat16), w2_ref[...],
                preferred_element_type=jnp.float32) + b2_ref[...]
    g = g * pl.reciprocal(1.0 + jnp.exp(-g), approx=True)

    # residual add in f32, cast to output dtype.
    o_ref[...] = (x + g).astype(o_ref.dtype)


def _round_up(n, m):
    return ((n + m - 1) // m) * m


def residual_layer(x, w1_t, b1, w2_t, b2, *, tm=512):
    """x: (N, H) f32; w*_t: (H, H) pre-transposed; b*: (1, H) f32.

    Weights are cast to bf16 here (MXU operands); accumulation stays f32.
    N is padded up to a multiple of the row tile and the result sliced back.
    """
    N, H = x.shape

    # Don't let the tile exceed (rounded-up) N; keep it a multiple of 8 (f32 sublane).
    tm = min(tm, _round_up(N, 8))
    n_pad = _round_up(N, tm)
    x_pad = jnp.pad(x, ((0, n_pad - N), (0, 0))) if n_pad != N else x

    w1_bf = w1_t.astype(jnp.bfloat16)
    w2_bf = w2_t.astype(jnp.bfloat16)

    grid = (pl.cdiv(n_pad, tm),)

    out = pl.pallas_call(
        _residual_kernel,
        out_shape=jax.ShapeDtypeStruct((n_pad, H), x.dtype),
        grid_spec=pltpu.PrefetchScalarGridSpec(
            num_scalar_prefetch=0,
            grid=grid,
            in_specs=[
                pl.BlockSpec((tm, H), lambda i: (i, 0)),   # x row tile
                pl.BlockSpec((H, H), lambda i: (0, 0)),    # W1^T (bf16, resident)
                pl.BlockSpec((1, H), lambda i: (0, 0)),    # b1 (f32)
                pl.BlockSpec((H, H), lambda i: (0, 0)),    # W2^T (bf16, resident)
                pl.BlockSpec((1, H), lambda i: (0, 0)),    # b2 (f32)
            ],
            out_specs=pl.BlockSpec((tm, H), lambda i: (i, 0)),
        ),
        # At H=128 / tm=512 the VMEM footprint (~1.5 MiB double-buffered) is far
        # below every chip's scoped default, so no vmem_limit_bytes override.
        compiler_params=pltpu.CompilerParams(
            dimension_semantics=("parallel",)),
    )(x_pad, w1_bf, b1, w2_bf, b2)

    return out[:N] if n_pad != N else out


def _glorot_orthogonal(key, shape, scale=2.0):
    # Deterministic stand-in for torch_geometric's glorot_orthogonal init:
    # orthogonal matrix rescaled so that var = scale / (fan_in + fan_out).
    a = jax.random.normal(key, shape, dtype=jnp.float32)
    q, _ = jnp.linalg.qr(a)
    q = q[: shape[0], : shape[1]]
    var = jnp.var(q)
    target = scale / (shape[0] + shape[1])
    return q * jnp.sqrt(target / (var + 1e-12))


def reference(x, w1_t, b1, w2_t, b2):
    # Pure-f32 reference for the module's forward pass.
    def swish(z):
        return z * jax.nn.sigmoid(z)
    h = swish(x @ w1_t + b1)
    return x + swish(h @ w2_t + b2)


if __name__ == "__main__":
    # ClofNet uses hidden_channels=128; N=1000 exercises the padded-tail path
    # and still yields a 2-step parallel grid at tm=512 (keeps both v7x TCs busy).
    N, H = 1000, 128
    key = jax.random.PRNGKey(0)
    kx, k1, k2 = jax.random.split(key, 3)

    x = jax.random.normal(kx, (N, H), dtype=jnp.float32)

    # PyTorch Linear weight is (out, in); biases filled with 0 by reset_parameters().
    w1 = _glorot_orthogonal(k1, (H, H), scale=2.0)   # lin1.weight
    w2 = _glorot_orthogonal(k2, (H, H), scale=2.0)   # lin2.weight
    b1 = jnp.zeros((1, H), dtype=jnp.float32)
    b2 = jnp.zeros((1, H), dtype=jnp.float32)

    # Pre-transpose for y = x @ W.T + b
    w1_t = w1.T
    w2_t = w2.T

    out = residual_layer(x, w1_t, b1, w2_t, b2, tm=512)
    out = jax.block_until_ready(out)

    ref = reference(x, w1_t, b1, w2_t, b2)
    # bf16 MXU operands + approx reciprocal -> relax tolerance vs. f32 reference.
    np.testing.assert_allclose(np.asarray(out), np.asarray(ref), rtol=5e-2, atol=5e-2)

    print("KERNEL_OK")
</pallas_src>

<mosaic_0001>
module attributes {stable_mosaic.version = 11 : i64} {
  func.func @_residual_kernel(%arg0: i32, %arg1: memref<512x128xf32, #tpu.memory_space<vmem>>, %arg2: memref<128x128xbf16, #tpu.memory_space<vmem>>, %arg3: memref<1x128xf32, #tpu.memory_space<vmem>>, %arg4: memref<128x128xbf16, #tpu.memory_space<vmem>>, %arg5: memref<1x128xf32, #tpu.memory_space<vmem>>, %arg6: memref<512x128xf32, #tpu.memory_space<vmem>>) attributes {dimension_semantics = [#tpu.dimension_semantics<parallel>], iteration_bounds = array<i64: 2>, scalar_prefetch = 0 : i64, scratch_operands = 0 : i64, tpu.core_type = #tpu.core_type<tc>, window_params = [{transform_indices = @transform_0, window_bounds = array<i64: 512, 128>}, {pipeline_mode = #tpu.pipeline_mode<synchronous>, transform_indices = @transform_1, window_bounds = array<i64: 128, 128>}, {pipeline_mode = #tpu.pipeline_mode<synchronous>, transform_indices = @transform_2, window_bounds = array<i64: 1, 128>}, {pipeline_mode = #tpu.pipeline_mode<synchronous>, transform_indices = @transform_3, window_bounds = array<i64: 128, 128>}, {pipeline_mode = #tpu.pipeline_mode<synchronous>, transform_indices = @transform_4, window_bounds = array<i64: 1, 128>}, {transform_indices = @transform_5, window_bounds = array<i64: 512, 128>}]} {
    %c0 = arith.constant 0 : index
    %c0_0 = arith.constant 0 : index
    %0 = vector.load %arg1[%c0, %c0_0] : memref<512x128xf32, #tpu.memory_space<vmem>>, vector<512x128xf32>
    %1 = arith.truncf %0 : vector<512x128xf32> to vector<512x128xbf16>
    %c0_1 = arith.constant 0 : index
    %c0_2 = arith.constant 0 : index
    %2 = vector.load %arg2[%c0_1, %c0_2] : memref<128x128xbf16, #tpu.memory_space<vmem>>, vector<128x128xbf16>
    %cst = arith.constant dense<0.000000e+00> : vector<512x128xf32>
    %3 = tpu.matmul %1, %2, %cst {dimension_numbers = #tpu.dot_dimension_numbers<[1], [0], [0], [1], [0, 0, 1, 1], [], []>} : vector<512x128xbf16>, vector<128x128xbf16>, vector<512x128xf32> -> vector<512x128xf32>
    %c0_3 = arith.constant 0 : index
    %c0_4 = arith.constant 0 : index
    %4 = vector.load %arg3[%c0_3, %c0_4] : memref<1x128xf32, #tpu.memory_space<vmem>>, vector<1x128xf32>
    %5 = vector.broadcast %4 : vector<1x128xf32> to vector<512x128xf32>
    %6 = arith.addf %3, %5 : vector<512x128xf32>
    %cst_5 = arith.constant 0.000000e+00 : f32
    %7 = vector.broadcast %cst_5 : f32 to vector<512x128xf32>
    %8 = arith.subf %7, %6 : vector<512x128xf32>
    %9 = math.exp %8 : vector<512x128xf32>
    %cst_6 = arith.constant 1.000000e+00 : f32
    %10 = vector.broadcast %cst_6 : f32 to vector<512x128xf32>
    %11 = arith.addf %10, %9 : vector<512x128xf32>
    %12 = tpu.reciprocal %11 {approx = true} : vector<512x128xf32> -> vector<512x128xf32>
    %13 = arith.mulf %6, %12 : vector<512x128xf32>
    %14 = arith.truncf %13 : vector<512x128xf32> to vector<512x128xbf16>
    %c0_7 = arith.constant 0 : index
    %c0_8 = arith.constant 0 : index
    %15 = vector.load %arg4[%c0_7, %c0_8] : memref<128x128xbf16, #tpu.memory_space<vmem>>, vector<128x128xbf16>
    %cst_9 = arith.constant dense<0.000000e+00> : vector<512x128xf32>
    %16 = tpu.matmul %14, %15, %cst_9 {dimension_numbers = #tpu.dot_dimension_numbers<[1], [0], [0], [1], [0, 0, 1, 1], [], []>} : vector<512x128xbf16>, vector<128x128xbf16>, vector<512x128xf32> -> vector<512x128xf32>
    %c0_10 = arith.constant 0 : index
    %c0_11 = arith.constant 0 : index
    %17 = vector.load %arg5[%c0_10, %c0_11] : memref<1x128xf32, #tpu.memory_space<vmem>>, vector<1x128xf32>
    %18 = vector.broadcast %17 : vector<1x128xf32> to vector<512x128xf32>
    %19 = arith.addf %16, %18 : vector<512x128xf32>
    %cst_12 = arith.constant 0.000000e+00 : f32
    %20 = vector.broadcast %cst_12 : f32 to vector<512x128xf32>
    %21 = arith.subf %20, %19 : vector<512x128xf32>
    %22 = math.exp %21 : vector<512x128xf32>
    %cst_13 = arith.constant 1.000000e+00 : f32
    %23 = vector.broadcast %cst_13 : f32 to vector<512x128xf32>
    %24 = arith.addf %23, %22 : vector<512x128xf32>
    %25 = tpu.reciprocal %24 {approx = true} : vector<512x128xf32> -> vector<512x128xf32>
    %26 = arith.mulf %19, %25 : vector<512x128xf32>
    %27 = arith.addf %0, %26 : vector<512x128xf32>
    %c0_14 = arith.constant 0 : index
    %c0_15 = arith.constant 0 : index
    %28 = vector.load %arg6[%c0_14, %c0_15] : memref<512x128xf32, #tpu.memory_space<vmem>>, vector<512x128xf32>
    tpu.vector_store %arg6[%c0_14, %c0_15], %27 {strides = array<i32>} : memref<512x128xf32, #tpu.memory_space<vmem>>, vector<512x128xf32>,
    return
  }
  func.func @transform_0(%arg0: i32) -> (i32, i32) {
    %c0_i32 = arith.constant 0 : i32
    %c0_i32_0 = arith.constant 0 : i32
    return %arg0, %c0_i32 : i32, i32
  }
  func.func @transform_1(%arg0: i32) -> (i32, i32) {
    %c0_i32 = arith.constant 0 : i32
    %c0_i32_0 = arith.constant 0 : i32
    %c0_i32_1 = arith.constant 0 : i32
    return %c0_i32, %c0_i32_0 : i32, i32
  }
  func.func @transform_2(%arg0: i32) -> (i32, i32) {
    %c0_i32 = arith.constant 0 : i32
    %c0_i32_0 = arith.constant 0 : i32
    %c0_i32_1 = arith.constant 0 : i32
    return %c0_i32, %c0_i32_0 : i32, i32
  }
  func.func @transform_3(%arg0: i32) -> (i32, i32) {
    %c0_i32 = arith.constant 0 : i32
    %c0_i32_0 = arith.constant 0 : i32
    %c0_i32_1 = arith.constant 0 : i32
    return %c0_i32, %c0_i32_0 : i32, i32
  }
  func.func @transform_4(%arg0: i32) -> (i32, i32) {
    %c0_i32 = arith.constant 0 : i32
    %c0_i32_0 = arith.constant 0 : i32
    %c0_i32_1 = arith.constant 0 : i32
    return %c0_i32, %c0_i32_0 : i32, i32
  }
  func.func @transform_5(%arg0: i32) -> (i32, i32) {
    %c0_i32 = arith.constant 0 : i32
    %c0_i32_0 = arith.constant 0 : i32
    return %arg0, %c0_i32 : i32, i32
  }
}

</mosaic_0001>

<bundles_post_ra>
// kernel: tpu_custom_call.1
= control target key start
LH: loop header
LB: loop body
LE: loop exit
PB: predicated region body
PF: predicated region fallthrough
CT: control target
= control target key end

     0   :  { %10 = vsyncpa [#allocation3], 0  ;;  %s3824_s0 = inlined_call_operand.hbm [shape: f32[1024,128], index: 0, kind: input, shape index: {}]   ;;  %s3825_s1 = inlined_call_operand.hbm [shape: bf16[128,128], index: 1, kind: input, shape index: {}]   ;;  %s3826_s2 = inlined_call_operand.vmem [shape: f32[1,128], index: 2, kind: input, shape index: {}]   ;;  %s3827_s3 = inlined_call_operand.hbm [shape: bf16[128,128], index: 3, kind: input, shape index: {}]   ;;  %s3828_s4 = inlined_call_operand.vmem [shape: f32[1,128], index: 4, kind: input, shape index: {}]   ;;  %s3829_s5 = inlined_call_operand.hbm [shape: f32[1024,128], index: 5, kind: output, shape index: {}]  }
   0x1   :  { %12 = vsyncpa [#allocation3 + $0x1], 0 }
   0x2   :  { %13 = vsyncpa [#allocation6], 0 }
   0x3   :  { %14 = vsyncpa [#allocation4], 0 }
   0x4   :  { %16 = vsyncpa [#allocation4 + $0x1], 0  ;;  %s2856_s18 = smov 0   ;;  %s2858_s19 = smov 0  }
   0x5   :  { %s2860_s20 = smov 0   ;;  %s2862_s21 = smov 0  }
   0x6 LB: > { %s2877_s22 = sadd.s32 4294967295, %s2816_s21   ;;  %s1886_s23 = sadd.s32 4294967294, %s2816_s21   ;;  %s2816_s21 = sphi %s2862_s21, %s3839_s21   ;;  %s2812_s20 = sphi %s2860_s20, %s3838_s20   ;;  %s2808_s19 = sphi %s2858_s19, %s3837_s19   ;;  %s2804_s18 = sphi %s2856_s18, %s3836_s18  }
   0x7   : > { %p42_p0 = scmp.ne.s32.totalorder %s2808_s19, %s2804_s18  ;;  %p43_p1 = scmp.eq.s32.totalorder %s2877_s22, 0 }
   0x8   : > { %p150_p2 = scmp.eq.s32.totalorder %s2877_s22, 1  ;;  %p156_p3 = scmp.eq.s32.totalorder %s1886_s23, 1 }
   0x9   : > { %p2886_p4 = por %p43_p1, %p42_p0  ;;  %p1887_p5 = scmp.ge.s32.totalorder %s2816_s21, 1 }
   0xa   : > { %p2891_p6 = por %p156_p3, %p42_p0  ;;  %p163_p7 = scmp.lt.s32.totalorder %s2816_s21, 3 }
   0xb   : > { %s174_s28 = sshll.u32 %s3825_s1, 4  ;;  %s2818_s30 = smov [#allocation5]   ;;  %s175_s28 = int_to_ptr.hbm [resolvable:$true] %s174_s28 }
   0xc   : > { %p2899_p8 = pnand %p1887_p5, %p163_p7  ;;  %s176_s6 = sshll.u32 %s2818_s30, 4  ;;  %s177_s6 = int_to_ptr.vmem [resolvable:$true] %s176_s6 }
   0xd   : > { %s191_s9 = sshll.u32 %s3827_s3, 4  ;;  %s2819_s10 = smov 64   ;;  %s192_s9 = int_to_ptr.hbm [resolvable:$true] %s191_s9 }
   0xe   : > { %p2014_p9 = pneg %p2899_p8  ;;  %s2820_s11 = smov 4  }
   0xf   : > { %s2821_s12 = smov [#allocation7]   ;;  %s2912_s14 = sadd.s32 1, %s2816_s21  }
  0x10   : > { %p2015_p10 = pnand %p2014_p9, %p43_p1  ;;  %s193_s13 = sshll.u32 %s2821_s12, 4  ;;  %s194_s13 = int_to_ptr.vmem [resolvable:$true] %s193_s13 }
  0x11   : > { %s29_s15 = sadd.s32 1, %s2812_s20  ;;  %s26_s16 = ssub.s32 %s2816_s21, %s2912_s14 }
  0x12   : > { %2017 = dma.hbm_to_vmem [thread:$0]  (!%p2015_p10), %s175_s28, 1024, %s177_s6, [#allocation6], %s2819_s10, %s2819_s10, %s2820_s11  }
  0x13   : > { %2020 = dma.hbm_to_vmem [thread:$0]  (!%p2015_p10), %s192_s9, 1024, %s194_s13, [#allocation6], %s2819_s10, %s2819_s10, %s2820_s11  }
  0x14   : > { %p36_p12 = scmp.ne.s32.totalorder %s2812_s20, %s2808_s19  ;;  %p27_p13 = scmp.eq.s32.totalorder %s26_s16, 0 }
  0x15   : > { %p37_p0 = scmp.eq.s32.totalorder %s2816_s21, 0  ;;  %p2031_p5 = scmp.lt.s32.totalorder %s2816_s21, 2 }
  0x16   : > { %p2922_p3 = por %p150_p2, %p36_p12  ;;  %s210_s26 = sand.u32 1, %s2812_s20  }
  0x17   : > { %s2928_s23 = scalar_select %p27_p13, %s2812_s20, %s29_s15  }
  0x18   : > { %p38_p7 = por %p37_p0, %p36_p12  ;;  %s1891_s27 = sshll.u32 %s210_s26, 9 }
  0x19   : > { %s1968_s28 = sshll.u32 %s2816_s21, 9  ;;  %s214_s8 = scalar_lea.vmem [#allocation2], %s1891_s27 }
  0x1a   : > { %s219_s7 = scalar_lea.hbm %s3824_s0, %s1968_s28  ;;  %s222_s9 = sshll.u32 %s214_s8, 4  ;;  %s223_s9 = int_to_ptr.vmem [resolvable:$true] %s222_s9 }
  0x1b   : > { %s220_s10 = sshll.u32 %s219_s7, 4  ;;  %p2935_p2 = pnand %p2031_p5, %p38_p7  ;;  %s221_s10 = int_to_ptr.hbm [resolvable:$true] %s220_s10 }
  0x1c   : > { %s211_s12 = scalar_lea.sflag [#allocation3], %s210_s26  ;;  %s2716_s13 = sshra.s32 %s221_s10, 4  ;;  %s2717_s13 = int_to_ptr.hbm [resolvable:$true] %s2716_s13 }
  0x1d   : > { %s2718_s15 = scalar_lea.hbm %s2717_s13, 512  ;;  %p2720_p10 = pneg %p2935_p2 }
  0x1e   : > { %p2719_p9 = scmp.ne.s32.totalorder %s2717_s13, %s2718_s15  ;;  %s2723_s28 = scalar_lea.hbm %s3824_s0, 1024 }
  0x1f   : > { %p2724_p0 = scmp.lt.s32.totalorder %s2717_s13, %s3824_s0  ;;  %p2725_p5 = scmp.lt.s32.totalorder %s2723_s28, %s2718_s15 }
  0x20   : > { %p2721_p12 = pnand %p2720_p10, %p2719_p9 }
  0x21   : > { %p2726_p7 = por %p2725_p5, %p2724_p0 }
  0x22   : > { %p2722_p13 = pneg %p2721_p12 }
  0x24   : > { %p2727_p11 = pnand %p2726_p7, %p2722_p13 }
  0x26   : > { %2730 = shalt.err (!%p2727_p11)
}
  0x27   : > { %s2822_s26 = smov 128   ;;  %s2823_s7 = smov 8  }
  0x28   : > { %2024 = dma.hbm_to_vmem [thread:$0]  (!%p2935_p2), %s221_s10, 8192, %s223_s9, %s211_s12, %s2822_s26, %s2822_s26, %s2823_s7  }
  0x29   : > { %234 = sbr.rel (%p2899_p8) target bundleno = 662 (0x296), region = 40  ;;  %s2952_s8 = sand.u32 (!%p2899_p8), 1, %s2808_s19  }
  0x2a   : > { %s1895_s13 = sshll.u32 (!%p2899_p8), %s2952_s8, 9  ;;  %s237_s15 = scalar_lea.sflag (!%p2899_p8), [#allocation3], %s2952_s8 }
  0x2b   : > { %s2958_s16 = scalar_lea.vmem (!%p2899_p8), [#allocation2], %s1895_s13 }
  0x2e   : > { %2791 = dma.done.wait (%p2886_p4), %s237_s15, 8192  }
  0x2f   : > { %2793 = vsyncadd (%p2886_p4), %s237_s15, 4294959104 }
  0x30   : > { %2795 = dma.done.wait (%p43_p1), [#allocation6], 2048  }
  0x31   : > { %2797 = vsyncadd (%p43_p1), [#allocation6], 4294965248  ;;  %v1976_v0 = vld [vmem:[#allocation5 + $0x38] sm:$0xff]  ;;  %v1975_v1 = vld [vmem:[#allocation5 + $0x30] sm:$0xff]  ;;  %s3279_s27 = scalar_lea.vmem [#allocation8], %s1895_s13  ;;  %s1985_s7 = sshll.u32 %s2877_s22, 9 }
  0x32   : > { %444 = vmatpush.bf16.msra.mxu0 %v1976_v0  ;;  %1986 = vmatpush.bf16.msra.mxu2 %v1976_v0  ;;  %v1974_v2 = vld [vmem:[#allocation5 + $0x28] sm:$0xff]  ;;  %v1973_v3 = vld [vmem:[#allocation5 + $0x20] sm:$0xff]  ;;  %v1972_v4 = vld [vmem:[#allocation5 + $0x18] sm:$0xff]  ;;  %s1790_s24 = scalar_lea.hbm %s3829_s5, %s1985_s7  ;;  %s1791_s29 = sshll.u32 %s3279_s27, 4  ;;  %s1792_s29 = int_to_ptr.vmem [resolvable:$true] %s1791_s29 }
  0x33   : > { %v1971_v5 = vld [vmem:[#allocation5 + $0x10] sm:$0xff]  ;;  %v1970_v6 = vld [vmem:[#allocation5 + $0x8] sm:$0xff]  ;;  %v1969_v7 = vld [vmem:[#allocation5] sm:$0xff]  ;;  %s1793_s9 = sshll.u32 %s1790_s24, 4  ;;  %s1779_s10 = scalar_lea.sflag [#allocation4], %s2952_s8  ;;  %s1794_s9 = int_to_ptr.hbm [resolvable:$true] %s1793_s9 }
  0x34   : > { %v280_v8 = vld [vmem:[%s2958_s16] sm:$0xff]  ;;  %v281_v9 = vld [vmem:[%s2958_s16 + $0x8] sm:$0xff]  ;;  %v282_v14 = vld [vmem:[%s2958_s16 + $0x10] sm:$0xff]  ;;  %s2760_s22 = sshra.s32 %s1794_s9, 4  ;;  %s2766_s30 = scalar_lea.hbm %s3829_s5, 1024  ;;  %s2761_s22 = int_to_ptr.hbm [resolvable:$true] %s2760_s22 }
  0x35   : > { %v312_v10 = vld [vmem:[%s2958_s16 + $0x100] sm:$0xff]  ;;  %v313_v11 = vld [vmem:[%s2958_s16 + $0x108] sm:$0xff]  ;;  %v344_v12 = vpack.c.bf16 %v281_v9, %v280_v8  ;;  %v283_v15 = vld [vmem:[%s2958_s16 + $0x18] sm:$0xff]  ;;  %s2762_s11 = scalar_lea.hbm %s2761_s22, 512  ;;  %p2767_p11 = scmp.lt.s32.totalorder %s2761_s22, %s3829_s5 }
  0x36   : > { %445 = vmatpush.bf16.msra.mxu0 %v1975_v1  ;;  %1987 = vmatpush.bf16.msra.mxu2 %v1975_v1  ;;  %v360_v13 = vpack.c.bf16 %v313_v11, %v312_v10  ;;  %v314_v16 = vld [vmem:[%s2958_s16 + $0x110] sm:$0xff]  ;;  %v315_v17 = vld [vmem:[%s2958_s16 + $0x118] sm:$0xff]  ;;  %v345_v18 = vpack.c.bf16 %v283_v15, %v282_v14  ;;  %v284_v20 = vld [vmem:[%s2958_s16 + $0x20] sm:$0xff]  ;;  %p2763_p1 = scmp.ne.s32.totalorder %s2761_s22, %s2762_s11  ;;  %p2768_p2 = scmp.lt.s32.totalorder %s2766_s30, %s2762_s11 }
  0x37   : > { %v361_v19 = vpack.c.bf16 %v315_v17, %v314_v16  ;;  %v285_v21 = vld [vmem:[%s2958_s16 + $0x28] sm:$0xff]  ;;  %v316_v22 = vld [vmem:[%s2958_s16 + $0x120] sm:$0xff]  ;;  %v286_v26 = vld [vmem:[%s2958_s16 + $0x30] sm:$0xff] }
  0x38   : > { %v317_v23 = vld [vmem:[%s2958_s16 + $0x128] sm:$0xff]  ;;  %v346_v24 = vpack.c.bf16 %v285_v21, %v284_v20  ;;  %v287_v27 = vld [vmem:[%s2958_s16 + $0x38] sm:$0xff]  ;;  %v318_v28 = vld [vmem:[%s2958_s16 + $0x130] sm:$0xff]  ;;  %p2764_p4 = pnand %p2763_p1, %p2922_p3  ;;  %p2769_p9 = por %p2768_p2, %p2767_p11 }
  0x39   : > { %v362_v25 = vpack.c.bf16 %v317_v23, %v316_v22  ;;  %v319_v29 = vld [vmem:[%s2958_s16 + $0x138] sm:$0xff]  ;;  %v347_v30 = vpack.c.bf16 %v287_v27, %v286_v26  ;;  %v288_v32 = vld [vmem:[%s2958_s16 + $0x40] sm:$0xff]  ;;  %v289_v33 = vld [vmem:[%s2958_s16 + $0x48] sm:$0xff] }
  0x3a   : > { %446 = vmatpush.bf16.msra.mxu0 %v1974_v2  ;;  %1988 = vmatpush.bf16.msra.mxu2 %v1974_v2  ;;  %v363_v31 = vpack.c.bf16 %v319_v29, %v318_v28  ;;  %v320_v34 = vld [vmem:[%s2958_s16 + $0x140] sm:$0xff]  ;;  %v321_v35 = vld [vmem:[%s2958_s16 + $0x148] sm:$0xff]  ;;  %v348_v36 = vpack.c.bf16 %v289_v33, %v288_v32  ;;  %v290_v38 = vld [vmem:[%s2958_s16 + $0x50] sm:$0xff]  ;;  %p2765_p8 = pneg %p2764_p4 }
  0x3b   : > { %v364_v37 = vpack.c.bf16 %v321_v35, %v320_v34  ;;  %v291_v39 = vld [vmem:[%s2958_s16 + $0x58] sm:$0xff]  ;;  %v322_v40 = vld [vmem:[%s2958_s16 + $0x150] sm:$0xff]  ;;  %v292_v44 = vld [vmem:[%s2958_s16 + $0x60] sm:$0xff] }
  0x3c   : > { %v323_v41 = vld [vmem:[%s2958_s16 + $0x158] sm:$0xff]  ;;  %v349_v42 = vpack.c.bf16 %v291_v39, %v290_v38  ;;  %v293_v45 = vld [vmem:[%s2958_s16 + $0x68] sm:$0xff]  ;;  %v324_v46 = vld [vmem:[%s2958_s16 + $0x160] sm:$0xff]  ;;  %p2770_p10 = pnand %p2769_p9, %p2765_p8 }
  0x3d   : > { %v365_v43 = vpack.c.bf16 %v323_v41, %v322_v40  ;;  %v325_v47 = vld [vmem:[%s2958_s16 + $0x168] sm:$0xff]  ;;  %v350_v48 = vpack.c.bf16 %v293_v45, %v292_v44  ;;  %v1984_v50 = vld [vmem:[#allocation7 + $0x38] sm:$0xff]  ;;  %v1983_v51 = vld [vmem:[#allocation7 + $0x30] sm:$0xff] }
  0x3e   : > { %447 = vmatpush.bf16.msra.mxu0 %v1973_v3  ;;  %1989 = vmatpush.bf16.msra.mxu2 %v1973_v3  ;;  %v366_v49 = vpack.c.bf16 %v325_v47, %v324_v46  ;;  %v1982_v52 = vld [vmem:[#allocation7 + $0x28] sm:$0xff]  ;;  %v294_v53 = vld [vmem:[%s2958_s16 + $0x70] sm:$0xff]  ;;  %v295_v54 = vld [vmem:[%s2958_s16 + $0x78] sm:$0xff] }
  0x3f   : > { %1097 = vmatpush.bf16.msra.mxu1 %v1984_v50  ;;  %1994 = vmatpush.bf16.msra.mxu3 %v1984_v50  ;;  %v326_v55 = vld [vmem:[%s2958_s16 + $0x170] sm:$0xff]  ;;  %v327_v56 = vld [vmem:[%s2958_s16 + $0x178] sm:$0xff]  ;;  %v1981_v57 = vld [vmem:[#allocation7 + $0x20] sm:$0xff]  ;;  %v351_v58 = vpack.c.bf16 %v295_v54, %v294_v53 }
  0x40   : > { %v367_v59 = vpack.c.bf16 %v327_v56, %v326_v55  ;;  %v1980_v60 = vld [vmem:[#allocation7 + $0x18] sm:$0xff]  ;;  %v1979_v61 = vld [vmem:[#allocation7 + $0x10] sm:$0xff]  ;;  %v1978_v62 = vld [vmem:[#allocation7 + $0x8] sm:$0xff] }
  0x41   : > { %v296_v63 = vld [vmem:[%s2958_s16 + $0x80] sm:$0xff]  ;;  %v297_v0 = vld [vmem:[%s2958_s16 + $0x88] sm:$0xff]  ;;  %v330_v20 = vld [vmem:[%s2958_s16 + $0x190] sm:$0xff] }
  0x42   : > { %448 = vmatpush.bf16.msra.mxu0 %v1972_v4  ;;  %1990 = vmatpush.bf16.msra.mxu2 %v1972_v4  ;;  %v328_v1 = vld [vmem:[%s2958_s16 + $0x180] sm:$0xff]  ;;  %v329_v2 = vld [vmem:[%s2958_s16 + $0x188] sm:$0xff]  ;;  %v331_v21 = vld [vmem:[%s2958_s16 + $0x198] sm:$0xff] }
  0x43   : > { %1098 = vmatpush.bf16.msra.mxu1 %v1983_v51  ;;  %1995 = vmatpush.bf16.msra.mxu3 %v1983_v51  ;;  %v3007_v3 = vld [vmem:[%s3826_s2] ss:$0 sm:$0xff]  ;;  %v369_v27 = vpack.c.bf16 %v331_v21, %v330_v20  ;;  %v333_v50 = vld [vmem:[%s2958_s16 + $0x1a8] sm:$0xff]  ;;  %v302_v21 = vld [vmem:[%s2958_s16 + $0xb0] sm:$0xff] }
  0x44   : > { %v1977_v4 = vld [vmem:[#allocation7] sm:$0xff] }
  0x45   : > { %v300_v44 = vld [vmem:[%s2958_s16 + $0xa0] sm:$0xff] }
  0x46   : > { %449 = vmatpush.bf16.msra.mxu0 %v1971_v5  ;;  %1991 = vmatpush.bf16.msra.mxu2 %v1971_v5  ;;  %v352_v5 = vpack.c.bf16 %v297_v0, %v296_v63 }
  0x47   : > { %1099 = vmatpush.bf16.msra.mxu1 %v1982_v52  ;;  %1996 = vmatpush.bf16.msra.mxu3 %v1982_v52 }
  0x4a   : > { %450 = vmatpush.bf16.msra.mxu0 %v1970_v6  ;;  %1992 = vmatpush.bf16.msra.mxu2 %v1970_v6  ;;  %v368_v6 = vpack.c.bf16 %v329_v2, %v328_v1 }
  0x4b   : > { %1100 = vmatpush.bf16.msra.mxu1 %v1981_v57  ;;  %1997 = vmatpush.bf16.msra.mxu3 %v1981_v57 }
  0x4e   : > { %451 = vmatpush.bf16.msra.mxu0 %v1969_v7  ;;  %1993 = vmatpush.bf16.msra.mxu2 %v1969_v7 }
  0x4f   : > { %1101 = vmatpush.bf16.msra.mxu1 %v1980_v60  ;;  %1998 = vmatpush.bf16.msra.mxu3 %v1980_v60 }
  0x51   : > { %452 = vmatmul.bf16.vlgmr.msra.gmra.mxu0 %v344_v12  ;;  %532 = vmatmul.bf16.vlgmr.msra.gmra.mxu2 %v360_v13 }
  0x53   : > { %1102 = vmatpush.bf16.msra.mxu1 %v1979_v61  ;;  %1999 = vmatpush.bf16.msra.mxu3 %v1979_v61 }
  0x57   : > { %1103 = vmatpush.bf16.msra.mxu1 %v1978_v62  ;;  %2000 = vmatpush.bf16.msra.mxu3 %v1978_v62 }
  0x5b   : > { %1104 = vmatpush.bf16.msra.mxu1 %v1977_v4  ;;  %2001 = vmatpush.bf16.msra.mxu3 %v1977_v4 }
  0x61   : > { %457 = vmatmul.bf16.gmra.mxu0 %v345_v18  ;;  %537 = vmatmul.bf16.gmra.mxu2 %v361_v19  ;;  %v298_v18 = vld [vmem:[%s2958_s16 + $0x90] sm:$0xff]  ;;  %v299_v19 = vld [vmem:[%s2958_s16 + $0x98] sm:$0xff] }
  0x62   : > { %v353_v26 = vpack.c.bf16 %v299_v19, %v298_v18 }
  0x71   : > { %462 = vmatmul.bf16.gmra.mxu0 %v346_v24  ;;  %542 = vmatmul.bf16.gmra.mxu2 %v362_v25 }
  0x81   : > { %467 = vmatmul.bf16.gmra.mxu0 %v347_v30  ;;  %547 = vmatmul.bf16.gmra.mxu2 %v363_v31 }
  0x91   : > { %472 = vmatmul.bf16.gmra.mxu0 %v348_v36  ;;  %552 = vmatmul.bf16.gmra.mxu2 %v364_v37 }
  0xa1   : > { %477 = vmatmul.bf16.gmra.mxu0 %v349_v42  ;;  %557 = vmatmul.bf16.gmra.mxu2 %v365_v43 }
  0xb1   : > { %482 = vmatmul.bf16.gmra.mxu0 %v350_v48  ;;  %562 = vmatmul.bf16.gmra.mxu2 %v366_v49  ;;  %v301_v48 = vld [vmem:[%s2958_s16 + $0xa8] sm:$0xff]  ;;  %v332_v49 = vld [vmem:[%s2958_s16 + $0x1a0] sm:$0xff] }
  0xb2   : > { %v354_v56 = vpack.c.bf16 %v301_v48, %v300_v44  ;;  %v370_v57 = vpack.c.bf16 %v333_v50, %v332_v49 }
  0xc1   : > { %487 = vmatmul.bf16.gmra.mxu0 %v351_v58  ;;  %567 = vmatmul.bf16.gmra.mxu2 %v367_v59 }
  0xce   : > { %v453_v7 = vpop.f32.mrf.mxu0 }
  0xcf   : > { %v3010_v8 = vadd.f32 %v3007_v3, %v453_v7 }
  0xd1   : > { %v613_v9 = vsub.f32 0.0, %v3010_v8  ;;  %492 = vmatmul.bf16.gmra.mxu0 %v352_v5  ;;  %572 = vmatmul.bf16.gmra.mxu2 %v368_v6 }
  0xd3   : > { %v677_v10 = vmul.f32 1.442695, %v613_v9 }
  0xd4   : > { %v533_v11 = vpop.f32.mrf.mxu2 }
  0xd5   : > { %v3014_v12 = vadd.f32 %v3007_v3, %v533_v11  ;;  %2077 = vpow2.f32 %v677_v10 }
  0xd6   : > { %v455_v13 = vpop.f32.mrf.mxu0 }
  0xd7   : > { %v645_v14 = vsub.f32 0.0, %v3014_v12  ;;  %v456_v15 = vadd.f32 %v3007_v3, %v455_v13 }
  0xd9   : > { %v741_v16 = vmul.f32 1.442695, %v645_v14  ;;  %v614_v17 = vsub.f32 0.0, %v456_v15 }
  0xdb   : > { %v679_v22 = vmul.f32 1.442695, %v614_v17  ;;  %2079 = vpow2.f32 %v741_v16  ;;  %v2078_v24 = vpop.eup %2077 }
  0xdc   : > { %v535_v23 = vpop.f32.mrf.mxu2  ;;  %v805_v31 = vadd.f32 1.0, %v2078_v24 }
  0xdd   : > { %2081 = vpow2.f32 %v679_v22  ;;  %v3023_v25 = vadd.f32 %v3007_v3, %v535_v23 }
  0xde   : > { %v458_v28 = vpop.f32.mrf.mxu0 }
  0xdf   : > { %v646_v29 = vsub.f32 0.0, %v3023_v25  ;;  %v3027_v30 = vadd.f32 %v3007_v3, %v458_v28 }
  0xe1   : > { %v743_v32 = vmul.f32 1.442695, %v646_v29  ;;  %v615_v33 = vsub.f32 0.0, %v3027_v30  ;;  %497 = vmatmul.bf16.gmra.mxu0 %v353_v26  ;;  %577 = vmatmul.bf16.gmra.mxu2 %v369_v27  ;;  %v2080_v34 = vpop.eup %2079  ;;  %v334_v26 = vld [vmem:[%s2958_s16 + $0x1b0] sm:$0xff]  ;;  %v335_v27 = vld [vmem:[%s2958_s16 + $0x1b8] sm:$0xff] }
  0xe2   : > { %v837_v40 = vadd.f32 1.0, %v2080_v34 }
  0xe3   : > { %v2082_v35 = vpop.eup %2081  ;;  %2083 = vpow2.f32 %v743_v32  ;;  %v681_v36 = vmul.f32 1.442695, %v615_v33 }
  0xe4   : > { %2085 = vrcp.f32 %v805_v31  ;;  %v806_v37 = vadd.f32 1.0, %v2082_v35  ;;  %v538_v38 = vpop.f32.mrf.mxu2  ;;  %v371_v35 = vpack.c.bf16 %v335_v27, %v334_v26 }
  0xe5   : > { %v3031_v39 = vadd.f32 %v3007_v3, %v538_v38 }
  0xe6   : > { %2087 = vrcp.f32 %v806_v37  ;;  %v460_v41 = vpop.f32.mrf.mxu0 }
  0xe7   : > { %2089 = vpow2.f32 %v681_v36  ;;  %v647_v42 = vsub.f32 0.0, %v3031_v39  ;;  %v3035_v43 = vadd.f32 %v3007_v3, %v460_v41 }
  0xe8   : > { %2091 = vrcp.f32 %v837_v40 }
  0xe9   : > { %v2084_v45 = vpop.eup %2083  ;;  %v745_v46 = vmul.f32 1.442695, %v647_v42  ;;  %v616_v47 = vsub.f32 0.0, %v3035_v43 }
  0xea   : > { %v2086_v51 = vpop.eup %2085  ;;  %v838_v52 = vadd.f32 1.0, %v2084_v45 }
  0xeb   : > { %2093 = vpow2.f32 %v745_v46  ;;  %v683_v53 = vmul.f32 1.442695, %v616_v47  ;;  %v933_v59 = vmul.f32 %v2086_v51, %v3010_v8 }
  0xec   : > { %v2088_v54 = vpop.eup %2087  ;;  %2095 = vrcp.f32 %v838_v52  ;;  %v540_v55 = vpop.f32.mrf.mxu2 }
  0xed   : > { %v2090_v58 = vpop.eup %2089  ;;  %2097 = vpow2.f32 %v683_v53  ;;  %v3044_v60 = vadd.f32 %v3007_v3, %v540_v55  ;;  %v934_v61 = vmul.f32 %v2088_v54, %v456_v15 }
  0xee   : > { %v463_v62 = vpop.f32.mrf.mxu0  ;;  %v2092_v2 = vpop.eup %2091  ;;  %v807_v4 = vadd.f32 1.0, %v2090_v58 }
  0xef   : > { %v648_v63 = vsub.f32 0.0, %v3044_v60  ;;  %v3048_v0 = vadd.f32 %v3007_v3, %v463_v62  ;;  %v997_v1 = vpack.c.bf16 %v934_v61, %v933_v59  ;;  %v965_v10 = vmul.f32 %v2092_v2, %v3014_v12  ;;  %v305_v2 = vld [vmem:[%s2958_s16 + $0xc8] sm:$0xff] }
  0xf1   : > { %v2094_v5 = vpop.eup %2093  ;;  %v747_v6 = vmul.f32 1.442695, %v648_v63  ;;  %v617_v7 = vsub.f32 0.0, %v3048_v0  ;;  %502 = vmatmul.bf16.gmra.mxu0 %v354_v56  ;;  %582 = vmatmul.bf16.gmra.mxu2 %v370_v57 }
  0xf2   : > { %v2096_v8 = vpop.eup %2095  ;;  %1105 = vmatmul.bf16.vlgmr.msra.gmra.mxu1 %v997_v1  ;;  %v839_v18 = vadd.f32 1.0, %v2094_v5  ;;  %v337_v5 = vld [vmem:[%s2958_s16 + $0x1c8] sm:$0xff] }
  0xf3   : > { %v2098_v9 = vpop.eup %2097  ;;  %2099 = vpow2.f32 %v747_v6  ;;  %v685_v11 = vmul.f32 1.442695, %v617_v7  ;;  %v966_v13 = vmul.f32 %v2096_v8, %v3023_v25  ;;  %v303_v25 = vld [vmem:[%s2958_s16 + $0xb8] sm:$0xff] }
  0xf4   : > { %2101 = vrcp.f32 %v807_v4  ;;  %v808_v14 = vadd.f32 1.0, %v2098_v9  ;;  %v543_v15 = vpop.f32.mrf.mxu2  ;;  %v355_v34 = vpack.c.bf16 %v303_v25, %v302_v21  ;;  %v336_v4 = vld [vmem:[%s2958_s16 + $0x1c0] sm:$0xff] }
  0xf5   : > { %v3054_v16 = vadd.f32 %v3007_v3, %v543_v15  ;;  %v1013_v17 = vpack.c.bf16 %v966_v13, %v965_v10  ;;  %v372_v13 = vpack.c.bf16 %v337_v5, %v336_v4 }
  0xf6   : > { %2103 = vrcp.f32 %v808_v14  ;;  %v465_v19 = vpop.f32.mrf.mxu0 }
  0xf7   : > { %2105 = vpow2.f32 %v685_v11  ;;  %v649_v12 = vsub.f32 0.0, %v3054_v16  ;;  %v3058_v20 = vadd.f32 %v3007_v3, %v465_v19  ;;  %1185 = vmatmul.bf16.vlgmr.msra.gmra.mxu3 %v1013_v17 }
  0xf8   : > { %2107 = vrcp.f32 %v839_v18 }
  0xf9   : > { %v2100_v22 = vpop.eup %2099  ;;  %v749_v23 = vmul.f32 1.442695, %v649_v12  ;;  %v618_v24 = vsub.f32 0.0, %v3058_v20 }
  0xfa   : > { %v2102_v28 = vpop.eup %2101  ;;  %v840_v29 = vadd.f32 1.0, %v2100_v22 }
  0xfb   : > { %2109 = vpow2.f32 %v749_v23  ;;  %v687_v31 = vmul.f32 1.442695, %v618_v24  ;;  %v935_v37 = vmul.f32 %v2102_v28, %v3027_v30 }
  0xfc   : > { %v2104_v32 = vpop.eup %2103  ;;  %2111 = vrcp.f32 %v840_v29  ;;  %v545_v33 = vpop.f32.mrf.mxu2 }
  0xfd   : > { %v2106_v36 = vpop.eup %2105  ;;  %2113 = vpow2.f32 %v687_v31  ;;  %v3067_v38 = vadd.f32 %v3007_v3, %v545_v33  ;;  %v936_v40 = vmul.f32 %v2104_v32, %v3035_v43 }
  0xfe   : > { %v468_v41 = vpop.f32.mrf.mxu0  ;;  %v2108_v46 = vpop.eup %2107  ;;  %v809_v47 = vadd.f32 1.0, %v2106_v36 }
  0xff   : > { %v650_v42 = vsub.f32 0.0, %v3067_v38  ;;  %v3072_v44 = vadd.f32 %v3007_v3, %v468_v41  ;;  %v998_v45 = vpack.c.bf16 %v936_v40, %v935_v37  ;;  %v967_v43 = vmul.f32 %v2108_v46, %v3031_v39  ;;  %v307_v46 = vld [vmem:[%s2958_s16 + $0xd8] sm:$0xff] }
 0x101   : > { %v2110_v48 = vpop.eup %2109  ;;  %v751_v49 = vmul.f32 1.442695, %v650_v42  ;;  %v619_v50 = vsub.f32 0.0, %v3072_v44  ;;  %507 = vmatmul.bf16.gmra.mxu0 %v355_v34  ;;  %587 = vmatmul.bf16.gmra.mxu2 %v371_v35 }
 0x102   : > { %v2112_v30 = vpop.eup %2111  ;;  %1110 = vmatmul.bf16.gmra.mxu1 %v998_v45  ;;  %v841_v58 = vadd.f32 1.0, %v2110_v48  ;;  %v339_v48 = vld [vmem:[%s2958_s16 + $0x1d8] sm:$0xff] }
 0x103   : > { %v2114_v51 = vpop.eup %2113  ;;  %2115 = vpow2.f32 %v751_v49  ;;  %v689_v52 = vmul.f32 1.442695, %v619_v50  ;;  %v968_v53 = vmul.f32 %v2112_v30, %v3044_v60  ;;  %v304_v60 = vld [vmem:[%s2958_s16 + $0xc0] sm:$0xff] }
 0x104   : > { %2117 = vrcp.f32 %v809_v47  ;;  %v810_v54 = vadd.f32 1.0, %v2114_v51  ;;  %v548_v55 = vpop.f32.mrf.mxu2  ;;  %v356_v11 = vpack.c.bf16 %v305_v2, %v304_v60  ;;  %v338_v47 = vld [vmem:[%s2958_s16 + $0x1d0] sm:$0xff] }
 0x105   : > { %v3078_v56 = vadd.f32 %v3007_v3, %v548_v55  ;;  %v1014_v57 = vpack.c.bf16 %v968_v53, %v967_v43  ;;  %v373_v53 = vpack.c.bf16 %v339_v48, %v338_v47 }
 0x106   : > { %2119 = vrcp.f32 %v810_v54  ;;  %v470_v59 = vpop.f32.mrf.mxu0 }
 0x107   : > { %2121 = vpow2.f32 %v689_v52  ;;  %v651_v39 = vsub.f32 0.0, %v3078_v56  ;;  %v3082_v61 = vadd.f32 %v3007_v3, %v470_v59  ;;  %1190 = vmatmul.bf16.gmra.mxu3 %v1014_v57 }
 0x108   : > { %2123 = vrcp.f32 %v841_v58 }
 0x109   : > { %v2116_v62 = vpop.eup %2115  ;;  %v753_v63 = vmul.f32 1.442695, %v651_v39  ;;  %v620_v1 = vsub.f32 0.0, %v3082_v61 }
 0x10a   : > { %v2118_v6 = vpop.eup %2117  ;;  %v842_v7 = vadd.f32 1.0, %v2116_v62 }
 0x10b   : > { %2125 = vpow2.f32 %v753_v63  ;;  %v691_v8 = vmul.f32 1.442695, %v620_v1  ;;  %v937_v15 = vmul.f32 %v2118_v6, %v3048_v0 }
 0x10c   : > { %v2120_v9 = vpop.eup %2119  ;;  %2127 = vrcp.f32 %v842_v7  ;;  %v550_v10 = vpop.f32.mrf.mxu2 }
 0x10d   : > { %v2122_v14 = vpop.eup %2121  ;;  %2129 = vpow2.f32 %v691_v8  ;;  %v3091_v17 = vadd.f32 %v3007_v3, %v550_v10  ;;  %v938_v18 = vmul.f32 %v2120_v9, %v3058_v20 }
 0x10e   : > { %v473_v19 = vpop.f32.mrf.mxu0  ;;  %v2124_v23 = vpop.eup %2123  ;;  %v811_v24 = vadd.f32 1.0, %v2122_v14 }
 0x10f   : > { %v652_v12 = vsub.f32 0.0, %v3091_v17  ;;  %v3096_v21 = vadd.f32 %v3007_v3, %v473_v19  ;;  %v999_v22 = vpack.c.bf16 %v938_v18, %v937_v15  ;;  %v969_v20 = vmul.f32 %v2124_v23, %v3054_v16  ;;  %v309_v23 = vld [vmem:[%s2958_s16 + $0xe8] sm:$0xff] }
 0x111   : > { %v2126_v25 = vpop.eup %2125  ;;  %v755_v26 = vmul.f32 1.442695, %v652_v12  ;;  %v621_v27 = vsub.f32 0.0, %v3096_v21  ;;  %512 = vmatmul.bf16.gmra.mxu0 %v356_v11  ;;  %592 = vmatmul.bf16.gmra.mxu2 %v372_v13 }
 0x112   : > { %v2128_v0 = vpop.eup %2127  ;;  %1115 = vmatmul.bf16.gmra.mxu1 %v999_v22  ;;  %v843_v36 = vadd.f32 1.0, %v2126_v25  ;;  %v341_v25 = vld [vmem:[%s2958_s16 + $0x1e8] sm:$0xff] }
 0x113   : > { %v2130_v28 = vpop.eup %2129  ;;  %2131 = vpow2.f32 %v755_v26  ;;  %v693_v29 = vmul.f32 1.442695, %v621_v27  ;;  %v970_v31 = vmul.f32 %v2128_v0, %v3067_v38  ;;  %v306_v38 = vld [vmem:[%s2958_s16 + $0xd0] sm:$0xff] }
 0x114   : > { %2133 = vrcp.f32 %v811_v24  ;;  %v812_v32 = vadd.f32 1.0, %v2130_v28  ;;  %v553_v33 = vpop.f32.mrf.mxu2  ;;  %v357_v52 = vpack.c.bf16 %v307_v46, %v306_v38  ;;  %v340_v24 = vld [vmem:[%s2958_s16 + $0x1e0] sm:$0xff] }
 0x115   : > { %v3102_v34 = vadd.f32 %v3007_v3, %v553_v33  ;;  %v1015_v35 = vpack.c.bf16 %v970_v31, %v969_v20  ;;  %v374_v31 = vpack.c.bf16 %v341_v25, %v340_v24 }
 0x116   : > { %2135 = vrcp.f32 %v812_v32  ;;  %v475_v37 = vpop.f32.mrf.mxu0 }
 0x117   : > { %2137 = vpow2.f32 %v693_v29  ;;  %v653_v16 = vsub.f32 0.0, %v3102_v34  ;;  %v3106_v40 = vadd.f32 %v3007_v3, %v475_v37  ;;  %1195 = vmatmul.bf16.gmra.mxu3 %v1015_v35 }
 0x118   : > { %2139 = vrcp.f32 %v843_v36 }
 0x119   : > { %v2132_v41 = vpop.eup %2131  ;;  %v757_v42 = vmul.f32 1.442695, %v653_v16  ;;  %v622_v45 = vsub.f32 0.0, %v3106_v40 }
 0x11a   : > { %v2134_v49 = vpop.eup %2133  ;;  %v844_v50 = vadd.f32 1.0, %v2132_v41 }
 0x11b   : > { %2141 = vpow2.f32 %v757_v42  ;;  %v695_v30 = vmul.f32 1.442695, %v622_v45  ;;  %v939_v55 = vmul.f32 %v2134_v49, %v3072_v44 }
 0x11c   : > { %v2136_v51 = vpop.eup %2135  ;;  %2143 = vrcp.f32 %v844_v50  ;;  %v555_v43 = vpop.f32.mrf.mxu2 }
 0x11d   : > { %v2138_v54 = vpop.eup %2137  ;;  %2145 = vpow2.f32 %v695_v30  ;;  %v3115_v57 = vadd.f32 %v3007_v3, %v555_v43  ;;  %v940_v58 = vmul.f32 %v2136_v51, %v3082_v61 }
 0x11e   : > { %v478_v59 = vpop.f32.mrf.mxu0  ;;  %v2140_v63 = vpop.eup %2139  ;;  %v813_v1 = vadd.f32 1.0, %v2138_v54 }
 0x11f   : > { %v654_v39 = vsub.f32 0.0, %v3115_v57  ;;  %v3120_v60 = vadd.f32 %v3007_v3, %v478_v59  ;;  %v1000_v62 = vpack.c.bf16 %v940_v58, %v939_v55  ;;  %v971_v61 = vmul.f32 %v2140_v63, %v3078_v56  ;;  %v310_v58 = vld [vmem:[%s2958_s16 + $0xf0] sm:$0xff]  ;;  %v311_v63 = vld [vmem:[%s2958_s16 + $0xf8] sm:$0xff] }
 0x121   : > { %v2142_v2 = vpop.eup %2141  ;;  %v759_v4 = vmul.f32 1.442695, %v654_v39  ;;  %v623_v5 = vsub.f32 0.0, %v3120_v60  ;;  %517 = vmatmul.bf16.gmra.mxu0 %v357_v52  ;;  %597 = vmatmul.bf16.gmra.mxu2 %v373_v53 }
 0x122   : > { %v2144_v44 = vpop.eup %2143  ;;  %1120 = vmatmul.bf16.gmra.mxu1 %v1000_v62  ;;  %v845_v14 = vadd.f32 1.0, %v2142_v2  ;;  %v343_v2 = vld [vmem:[%s2958_s16 + $0x1f8] sm:$0xff] }
 0x123   : > { %v2146_v6 = vpop.eup %2145  ;;  %2147 = vpow2.f32 %v759_v4  ;;  %v697_v7 = vmul.f32 1.442695, %v623_v5  ;;  %v972_v8 = vmul.f32 %v2144_v44, %v3091_v17  ;;  %v308_v17 = vld [vmem:[%s2958_s16 + $0xe0] sm:$0xff] }
 0x124   : > { %2149 = vrcp.f32 %v813_v1  ;;  %v814_v9 = vadd.f32 1.0, %v2146_v6  ;;  %v558_v10 = vpop.f32.mrf.mxu2  ;;  %v358_v29 = vpack.c.bf16 %v309_v23, %v308_v17  ;;  %v342_v1 = vld [vmem:[%s2958_s16 + $0x1f0] sm:$0xff] }
 0x125   : > { %v3126_v11 = vadd.f32 %v3007_v3, %v558_v10  ;;  %v1016_v13 = vpack.c.bf16 %v972_v8, %v971_v61  ;;  %v375_v8 = vpack.c.bf16 %v343_v2, %v342_v1 }
 0x126   : > { %2151 = vrcp.f32 %v814_v9  ;;  %v480_v15 = vpop.f32.mrf.mxu0 }
 0x127   : > { %2153 = vpow2.f32 %v697_v7  ;;  %v655_v56 = vsub.f32 0.0, %v3126_v11  ;;  %v3130_v18 = vadd.f32 %v3007_v3, %v480_v15  ;;  %1200 = vmatmul.bf16.gmra.mxu3 %v1016_v13  ;;  %v359_v7 = vpack.c.bf16 %v311_v63, %v310_v58 }
 0x128   : > { %2155 = vrcp.f32 %v845_v14 }
 0x129   : > { %v2148_v19 = vpop.eup %2147  ;;  %v761_v12 = vmul.f32 1.442695, %v655_v56  ;;  %v624_v22 = vsub.f32 0.0, %v3130_v18 }
 0x12a   : > { %v2150_v26 = vpop.eup %2149  ;;  %v846_v27 = vadd.f32 1.0, %v2148_v19 }
 0x12b   : > { %2157 = vpow2.f32 %v761_v12  ;;  %v699_v0 = vmul.f32 1.442695, %v624_v22  ;;  %v941_v33 = vmul.f32 %v2150_v26, %v3096_v21 }
 0x12c   : > { %v2152_v28 = vpop.eup %2151  ;;  %2159 = vrcp.f32 %v846_v27  ;;  %v560_v20 = vpop.f32.mrf.mxu2 }
 0x12d   : > { %v2154_v32 = vpop.eup %2153  ;;  %v942_v35 = vmul.f32 %v2152_v28, %v3106_v40  ;;  %2161 = vpow2.f32 %v699_v0  ;;  %v3140_v36 = vadd.f32 %v3007_v3, %v560_v20 }
 0x12e   : > { %v483_v37 = vpop.f32.mrf.mxu0  ;;  %v2156_v42 = vpop.eup %2155  ;;  %v815_v45 = vadd.f32 1.0, %v2154_v32 }
 0x12f   : > { %v656_v16 = vsub.f32 0.0, %v3140_v36  ;;  %v3144_v38 = vadd.f32 %v3007_v3, %v483_v37  ;;  %v1001_v41 = vpack.c.bf16 %v942_v35, %v941_v33  ;;  %v973_v49 = vmul.f32 %v2156_v42, %v3102_v34 }
 0x131   : > { %v2158_v46 = vpop.eup %2157  ;;  %v763_v47 = vmul.f32 1.442695, %v656_v16  ;;  %v625_v48 = vsub.f32 0.0, %v3144_v38  ;;  %522 = vmatmul.bf16.gmra.mxu0 %v358_v29  ;;  %602 = vmatmul.bf16.gmra.mxu2 %v374_v31 }
 0x132   : > { %v2160_v21 = vpop.eup %2159  ;;  %1125 = vmatmul.bf16.gmra.mxu1 %v1001_v41  ;;  %v847_v54 = vadd.f32 1.0, %v2158_v46 }
 0x133   : > { %v2162_v40 = vpop.eup %2161  ;;  %v974_v50 = vmul.f32 %v2160_v21, %v3115_v57  ;;  %2163 = vpow2.f32 %v763_v47  ;;  %v701_v30 = vmul.f32 1.442695, %v625_v48 }
 0x134   : > { %2165 = vrcp.f32 %v815_v45  ;;  %v816_v51 = vadd.f32 1.0, %v2162_v40  ;;  %v563_v43 = vpop.f32.mrf.mxu2 }
 0x135   : > { %v3150_v52 = vadd.f32 %v3007_v3, %v563_v43  ;;  %v1017_v53 = vpack.c.bf16 %v974_v50, %v973_v49 }
 0x136   : > { %2167 = vrcp.f32 %v816_v51  ;;  %v485_v55 = vpop.f32.mrf.mxu0 }
 0x137   : > { %2169 = vpow2.f32 %v701_v30  ;;  %v657_v34 = vsub.f32 0.0, %v3150_v52  ;;  %v3154_v57 = vadd.f32 %v3007_v3, %v485_v55  ;;  %1205 = vmatmul.bf16.gmra.mxu3 %v1017_v53 }
 0x138   : > { %2171 = vrcp.f32 %v847_v54 }
 0x139   : > { %v2164_v59 = vpop.eup %2163  ;;  %v765_v39 = vmul.f32 1.442695, %v657_v34  ;;  %v626_v62 = vsub.f32 0.0, %v3154_v57 }
 0x13a   : > { %v2166_v4 = vpop.eup %2165  ;;  %v848_v5 = vadd.f32 1.0, %v2164_v59 }
 0x13b   : > { %2173 = vpow2.f32 %v765_v39  ;;  %v703_v44 = vmul.f32 1.442695, %v626_v62  ;;  %v943_v10 = vmul.f32 %v2166_v4, %v3120_v60 }
 0x13c   : > { %v2168_v6 = vpop.eup %2167  ;;  %2175 = vrcp.f32 %v848_v5  ;;  %v565_v61 = vpop.f32.mrf.mxu2 }
 0x13d   : > { %v2170_v9 = vpop.eup %2169  ;;  %v944_v13 = vmul.f32 %v2168_v6, %v3130_v18  ;;  %2177 = vpow2.f32 %v703_v44  ;;  %v566_v14 = vadd.f32 %v3007_v3, %v565_v61 }
 0x13e   : > { %v488_v15 = vpop.f32.mrf.mxu0  ;;  %v2172_v12 = vpop.eup %2171  ;;  %v817_v22 = vadd.f32 1.0, %v2170_v9 }
 0x13f   : > { %v658_v56 = vsub.f32 0.0, %v566_v14  ;;  %v3165_v17 = vadd.f32 %v3007_v3, %v488_v15  ;;  %v1002_v19 = vpack.c.bf16 %v944_v13, %v943_v10  ;;  %v975_v26 = vmul.f32 %v2172_v12, %v3126_v11 }
 0x141   : > { %v2174_v23 = vpop.eup %2173  ;;  %v767_v24 = vmul.f32 1.442695, %v658_v56  ;;  %v627_v25 = vsub.f32 0.0, %v3165_v17  ;;  %527 = vmatmul.bf16.gmra.mxu0 %v359_v7  ;;  %607 = vmatmul.bf16.gmra.mxu2 %v375_v8 }
 0x142   : > { %v2176_v60 = vpop.eup %2175  ;;  %1130 = vmatmul.bf16.gmra.mxu1 %v1002_v19  ;;  %v849_v32 = vadd.f32 1.0, %v2174_v23 }
 0x143   : > { %v2178_v18 = vpop.eup %2177  ;;  %v976_v27 = vmul.f32 %v2176_v60, %v3140_v36  ;;  %2179 = vpow2.f32 %v767_v24  ;;  %v705_v0 = vmul.f32 1.442695, %v627_v25 }
 0x144   : > { %2181 = vrcp.f32 %v817_v22  ;;  %v818_v28 = vadd.f32 1.0, %v2178_v18  ;;  %v568_v20 = vpop.f32.mrf.mxu2 }
 0x145   : > { %v3171_v29 = vadd.f32 %v3007_v3, %v568_v20  ;;  %v1018_v31 = vpack.c.bf16 %v976_v27, %v975_v26 }
 0x146   : > { %2183 = vrcp.f32 %v818_v28  ;;  %v490_v33 = vpop.f32.mrf.mxu0 }
 0x147   : > { %2185 = vpow2.f32 %v705_v0  ;;  %v659_v35 = vsub.f32 0.0, %v3171_v29  ;;  %v491_v37 = vadd.f32 %v3007_v3, %v490_v33  ;;  %1210 = vmatmul.bf16.gmra.mxu3 %v1018_v31 }
 0x148   : > { %2187 = vrcp.f32 %v849_v32 }
 0x149   : > { %v2180_v11 = vpop.eup %2179  ;;  %v769_v36 = vmul.f32 1.442695, %v659_v35  ;;  %v628_v16 = vsub.f32 0.0, %v491_v37 }
 0x14a   : > { %v2182_v41 = vpop.eup %2181  ;;  %v850_v42 = vadd.f32 1.0, %v2180_v11 }
 0x14b   : > { %2189 = vpow2.f32 %v769_v36  ;;  %v707_v45 = vmul.f32 1.442695, %v628_v16  ;;  %v945_v21 = vmul.f32 %v2182_v41, %v3144_v38 }
 0x14c   : > { %v2184_v46 = vpop.eup %2183  ;;  %2191 = vrcp.f32 %v850_v42  ;;  %v570_v47 = vpop.f32.mrf.mxu2 }
 0x14d   : > { %v2186_v48 = vpop.eup %2185  ;;  %v946_v40 = vmul.f32 %v2184_v46, %v3154_v57  ;;  %2193 = vpow2.f32 %v707_v45  ;;  %v571_v49 = vadd.f32 %v3007_v3, %v570_v47 }
 0x14e   : > { %v493_v50 = vpop.f32.mrf.mxu0  ;;  %v2188_v53 = vpop.eup %2187  ;;  %v819_v54 = vadd.f32 1.0, %v2186_v48 }
 0x14f   : > { %v660_v30 = vsub.f32 0.0, %v571_v49  ;;  %v3179_v51 = vadd.f32 %v3007_v3, %v493_v50  ;;  %v1003_v43 = vpack.c.bf16 %v946_v40, %v945_v21  ;;  %v977_v57 = vmul.f32 %v2188_v53, %v3150_v52 }
 0x151   : > { %v2190_v55 = vpop.eup %2189  ;;  %v771_v34 = vmul.f32 1.442695, %v660_v30  ;;  %v629_v58 = vsub.f32 0.0, %v3179_v51  ;;  %v3206_v30 = vld [vmem:[%s3828_s4] ss:$0 sm:$0xff] }
 0x152   : > { %v2192_v59 = vpop.eup %2191  ;;  %1135 = vmatmul.bf16.gmra.mxu1 %v1003_v43  ;;  %v851_v5 = vadd.f32 1.0, %v2190_v55 }
 0x153   : > { %v2194_v38 = vpop.eup %2193  ;;  %v978_v39 = vmul.f32 %v2192_v59, %v566_v14  ;;  %2195 = vpow2.f32 %v771_v34  ;;  %v709_v62 = vmul.f32 1.442695, %v629_v58 }
 0x154   : > { %2197 = vrcp.f32 %v819_v54  ;;  %v820_v63 = vadd.f32 1.0, %v2194_v38  ;;  %v573_v1 = vpop.f32.mrf.mxu2 }
 0x155   : > { %v3184_v2 = vadd.f32 %v3007_v3, %v573_v1  ;;  %v1019_v4 = vpack.c.bf16 %v978_v39, %v977_v57 }
 0x156   : > { %2199 = vrcp.f32 %v820_v63  ;;  %v495_v44 = vpop.f32.mrf.mxu0 }
 0x157   : > { %2201 = vpow2.f32 %v709_v62  ;;  %v661_v6 = vsub.f32 0.0, %v3184_v2  ;;  %v496_v61 = vadd.f32 %v3007_v3, %v495_v44  ;;  %1215 = vmatmul.bf16.gmra.mxu3 %v1019_v4 }
 0x158   : > { %2203 = vrcp.f32 %v851_v5 }
 0x159   : > { %v2196_v52 = vpop.eup %2195  ;;  %v773_v7 = vmul.f32 1.442695, %v661_v6  ;;  %v630_v8 = vsub.f32 0.0, %v496_v61 }
 0x15a   : > { %v2198_v9 = vpop.eup %2197  ;;  %v852_v10 = vadd.f32 1.0, %v2196_v52 }
 0x15b   : > { %2205 = vpow2.f32 %v773_v7  ;;  %v711_v13 = vmul.f32 1.442695, %v630_v8  ;;  %v947_v19 = vmul.f32 %v2198_v9, %v3165_v17 }
 0x15c   : > { %v2200_v14 = vpop.eup %2199  ;;  %2207 = vrcp.f32 %v852_v10  ;;  %v575_v15 = vpop.f32.mrf.mxu2 }
 0x15d   : > { %v2202_v56 = vpop.eup %2201  ;;  %v948_v12 = vmul.f32 %v2200_v14, %v491_v37  ;;  %2209 = vpow2.f32 %v711_v13  ;;  %v576_v22 = vadd.f32 %v3007_v3, %v575_v15 }
 0x15e   : > { %v498_v23 = vpop.f32.mrf.mxu0  ;;  %v2204_v18 = vpop.eup %2203  ;;  %v821_v26 = vadd.f32 1.0, %v2202_v56 }
 0x15f   : > { %v662_v24 = vsub.f32 0.0, %v576_v22  ;;  %v3191_v25 = vadd.f32 %v3007_v3, %v498_v23  ;;  %v1004_v60 = vpack.c.bf16 %v948_v12, %v947_v19  ;;  %v979_v17 = vmul.f32 %v2204_v18, %v3171_v29 }
 0x161   : > { %v2206_v27 = vpop.eup %2205  ;;  %v775_v0 = vmul.f32 1.442695, %v662_v24  ;;  %v631_v28 = vsub.f32 0.0, %v3191_v25 }
 0x162   : > { %v2208_v20 = vpop.eup %2207  ;;  %1140 = vmatmul.bf16.gmra.mxu1 %v1004_v60  ;;  %v853_v16 = vadd.f32 1.0, %v2206_v27 }
 0x163   : > { %v2210_v31 = vpop.eup %2209  ;;  %v980_v32 = vmul.f32 %v2208_v20, %v571_v49  ;;  %2211 = vpow2.f32 %v775_v0  ;;  %v713_v33 = vmul.f32 1.442695, %v631_v28 }
 0x164   : > { %2213 = vrcp.f32 %v821_v26  ;;  %v822_v35 = vadd.f32 1.0, %v2210_v31  ;;  %v578_v37 = vpop.f32.mrf.mxu2 }
 0x165   : > { %v3196_v11 = vadd.f32 %v3007_v3, %v578_v37  ;;  %v1020_v36 = vpack.c.bf16 %v980_v32, %v979_v17 }
 0x166   : > { %2215 = vrcp.f32 %v822_v35  ;;  %v500_v41 = vpop.f32.mrf.mxu0 }
 0x167   : > { %2217 = vpow2.f32 %v713_v33  ;;  %v663_v42 = vsub.f32 0.0, %v3196_v11  ;;  %v3200_v45 = vadd.f32 %v3007_v3, %v500_v41  ;;  %1220 = vmatmul.bf16.gmra.mxu3 %v1020_v36  ;;  %v3242_v36 = vld [vmem:[%s3826_s2] ss:$0 sm:$0xff] }
 0x168   : > { %2219 = vrcp.f32 %v853_v16 }
 0x169   : > { %v2212_v29 = vpop.eup %2211  ;;  %v777_v46 = vmul.f32 1.442695, %v663_v42  ;;  %v632_v47 = vsub.f32 0.0, %v3200_v45 }
 0x16a   : > { %v2214_v48 = vpop.eup %2213  ;;  %v854_v21 = vadd.f32 1.0, %v2212_v29 }
 0x16b   : > { %2221 = vpow2.f32 %v777_v46  ;;  %v715_v40 = vmul.f32 1.442695, %v632_v47  ;;  %v949_v53 = vmul.f32 %v2214_v48, %v3179_v51 }
 0x16c   : > { %v2216_v49 = vpop.eup %2215  ;;  %2223 = vrcp.f32 %v854_v21  ;;  %v580_v50 = vpop.f32.mrf.mxu2 }
 0x16d   : > { %v2218_v43 = vpop.eup %2217  ;;  %v950_v54 = vmul.f32 %v2216_v49, %v496_v61  ;;  %2225 = vpow2.f32 %v715_v40  ;;  %v3210_v55 = vadd.f32 %v3007_v3, %v580_v50 }
 0x16e   : > { %v503_v34 = vpop.f32.mrf.mxu0  ;;  %v2220_v39 = vpop.eup %2219  ;;  %v823_v62 = vadd.f32 1.0, %v2218_v43 }
 0x16f   : > { %v664_v58 = vsub.f32 0.0, %v3210_v55  ;;  %v3214_v59 = vadd.f32 %v3007_v3, %v503_v34  ;;  %v1106_v38 = vpop.f32.mrf.mxu1  ;;  %v1005_v57 = vpack.c.bf16 %v950_v54, %v949_v53  ;;  %v981_v61 = vmul.f32 %v2220_v39, %v3184_v2 }
 0x170   : > { %v3217_v63 = vadd.f32 %v3206_v30, %v1106_v38 }
 0x171   : > { %v2222_v1 = vpop.eup %2221  ;;  %v779_v51 = vmul.f32 1.442695, %v664_v58  ;;  %v633_v4 = vsub.f32 0.0, %v3214_v59 }
 0x172   : > { %v2224_v5 = vpop.eup %2223  ;;  %v1266_v44 = vsub.f32 0.0, %v3217_v63  ;;  %1145 = vmatmul.bf16.gmra.mxu1 %v1005_v57  ;;  %v855_v15 = vadd.f32 1.0, %v2222_v1 }
 0x173   : > { %v2226_v6 = vpop.eup %2225  ;;  %v982_v52 = vmul.f32 %v2224_v5, %v576_v22  ;;  %2227 = vpow2.f32 %v779_v51  ;;  %v717_v7 = vmul.f32 1.442695, %v633_v4 }
 0x174   : > { %2229 = vrcp.f32 %v823_v62  ;;  %v824_v8 = vadd.f32 1.0, %v2226_v6  ;;  %v1330_v9 = vmul.f32 1.442695, %v1266_v44  ;;  %v583_v10 = vpop.f32.mrf.mxu2 }
 0x175   : > { %2231 = vpow2.f32 %v717_v7  ;;  %v3223_v13 = vadd.f32 %v3007_v3, %v583_v10  ;;  %v1021_v14 = vpack.c.bf16 %v982_v52, %v981_v61 }
 0x176   : > { %2233 = vrcp.f32 %v824_v8  ;;  %v505_v56 = vpop.f32.mrf.mxu0 }
 0x177   : > { %2235 = vpow2.f32 %v1330_v9  ;;  %v665_v19 = vsub.f32 0.0, %v3223_v13  ;;  %v3227_v2 = vadd.f32 %v3007_v3, %v505_v56  ;;  %v1108_v12 = vpop.f32.mrf.mxu1  ;;  %1225 = vmatmul.bf16.gmra.mxu3 %v1021_v14 }
 0x178   : > { %v3230_v22 = vadd.f32 %v3206_v30, %v1108_v12  ;;  %2237 = vrcp.f32 %v855_v15 }
 0x179   : > { %v2228_v23 = vpop.eup %2227  ;;  %v781_v24 = vmul.f32 1.442695, %v665_v19  ;;  %v634_v60 = vsub.f32 0.0, %v3227_v2 }
 0x17a   : > { %v2230_v18 = vpop.eup %2229  ;;  %v856_v26 = vadd.f32 1.0, %v2228_v23  ;;  %v1267_v27 = vsub.f32 0.0, %v3230_v22  ;;  %v1186_v0 = vpop.f32.mrf.mxu3 }
 0x17b   : > { %v2232_v28 = vpop.eup %2231  ;;  %2239 = vpow2.f32 %v781_v24  ;;  %v719_v20 = vmul.f32 1.442695, %v634_v60  ;;  %v3235_v3 = vadd.f32 %v3206_v30, %v1186_v0  ;;  %v951_v41 = vmul.f32 %v2230_v18, %v3191_v25  ;;  %v2590_v18 = vld [vmem:[%s2958_s16] sm:$0xff] }
 0x17c   : > { %v2234_v31 = vpop.eup %2233  ;;  %2241 = vrcp.f32 %v856_v26  ;;  %v1332_v17 = vmul.f32 1.442695, %v1267_v27  ;;  %v585_v32 = vpop.f32.mrf.mxu2  ;;  %v825_v42 = vadd.f32 1.0, %v2232_v28 }
 0x17d   : > { %v2236_v33 = vpop.eup %2235  ;;  %v952_v35 = vmul.f32 %v2234_v31, %v3200_v45  ;;  %2243 = vpow2.f32 %v719_v20  ;;  %v1298_v37 = vsub.f32 0.0, %v3235_v3  ;;  %v3245_v16 = vadd.f32 %v3242_v36, %v585_v32 }
 0x17e   : > { %v1458_v29 = vadd.f32 1.0, %v2236_v33  ;;  %v508_v46 = vpop.f32.mrf.mxu0  ;;  %2245 = vpow2.f32 %v1332_v17  ;;  %v2238_v40 = vpop.eup %2237 }
 0x17f   : > { %v1394_v47 = vmul.f32 1.442695, %v1298_v37  ;;  %v666_v45 = vsub.f32 0.0, %v3245_v16  ;;  %v3250_v48 = vadd.f32 %v3242_v36, %v508_v46  ;;  %v1111_v21 = vpop.f32.mrf.mxu1  ;;  %v1006_v50 = vpack.c.bf16 %v952_v35, %v951_v41 }
 0x180   : > { %2247 = vrcp.f32 %v1458_v29  ;;  %v3253_v49 = vadd.f32 %v3206_v30, %v1111_v21  ;;  %v983_v51 = vmul.f32 %v2238_v40, %v3196_v11 }
 0x181   : > { %v2240_v43 = vpop.eup %2239  ;;  %2249 = vpow2.f32 %v1394_v47  ;;  %v783_v25 = vmul.f32 1.442695, %v666_v45  ;;  %v635_v53 = vsub.f32 0.0, %v3250_v48 }
 0x182   : > { %v2242_v54 = vpop.eup %2241  ;;  %2251 = vrcp.f32 %v825_v42  ;;  %v857_v34 = vadd.f32 1.0, %v2240_v43  ;;  %v1268_v58 = vsub.f32 0.0, %v3253_v49  ;;  %1150 = vmatmul.bf16.gmra.mxu1 %v1006_v50  ;;  %v1188_v38 = vpop.f32.mrf.mxu3 }
 0x183   : > { %v2244_v57 = vpop.eup %2243  ;;  %v984_v39 = vmul.f32 %v2242_v54, %v3210_v55  ;;  %2253 = vpow2.f32 %v783_v25  ;;  %v721_v62 = vmul.f32 1.442695, %v635_v53  ;;  %v3259_v1 = vadd.f32 %v3206_v30, %v1188_v38 }
 0x184   : > { %2255 = vrcp.f32 %v857_v34  ;;  %v826_v4 = vadd.f32 1.0, %v2244_v57  ;;  %v1334_v5 = vmul.f32 1.442695, %v1268_v58  ;;  %v588_v44 = vpop.f32.mrf.mxu2  ;;  %v2246_v6 = vpop.eup %2245 }
 0x185   : > { %2257 = vpow2.f32 %v721_v62  ;;  %v1299_v61 = vsub.f32 0.0, %v3259_v1  ;;  %v3264_v52 = vadd.f32 %v3242_v36, %v588_v44  ;;  %v1459_v55 = vadd.f32 1.0, %v2246_v6 }
 0x186   : > { %v2248_v7 = vpop.eup %2247  ;;  %2259 = vrcp.f32 %v826_v4  ;;  %v510_v8 = vpop.f32.mrf.mxu0  ;;  %v1022_v9 = vpack.c.bf16 %v984_v39, %v983_v51  ;;  %v2591_v39 = vld [vmem:[%s2958_s16 + $0x8] sm:$0xff] }
 0x187   : > { %v2250_v10 = vpop.eup %2249  ;;  %v1586_v11 = vmul.f32 %v2248_v7, %v3217_v63  ;;  %2261 = vpow2.f32 %v1334_v5  ;;  %v1396_v14 = vmul.f32 1.442695, %v1299_v61  ;;  %v667_v15 = vsub.f32 0.0, %v3264_v52  ;;  %v1113_v56 = vpop.f32.mrf.mxu1  ;;  %v2592_v7 = vld [vmem:[%s2958_s16 + $0x100] sm:$0xff] }
 0x188   : > { %v2252_v19 = vpop.eup %2251  ;;  %2263 = vrcp.f32 %v1459_v55  ;;  %v1490_v12 = vadd.f32 1.0, %v2250_v10  ;;  %v3269_v23 = vadd.f32 %v3242_v36, %v510_v8  ;;  %v3272_v24 = vadd.f32 %v3206_v30, %v1113_v56  ;;  %1230 = vmatmul.bf16.gmra.mxu3 %v1022_v9 }
 0x189   : > { %v2254_v60 = vpop.eup %2253  ;;  %v1650_v26 = vadd.f32 %v2590_v18, %v1586_v11  ;;  %2265 = vpow2.f32 %v1396_v14  ;;  %v785_v63 = vmul.f32 1.442695, %v667_v15  ;;  %v953_v42 = vmul.f32 %v2252_v19, %v3214_v59 }
 0x18a   : > { %v2256_v27 = vpop.eup %2255  ;;  %2267 = vrcp.f32 %v1490_v12  ;;  %v858_v0 = vadd.f32 1.0, %v2254_v60  ;;  %v636_v28 = vsub.f32 0.0, %v3269_v23  ;;  %v1269_v20 = vsub.f32 0.0, %v3272_v24  ;;  %v1191_v31 = vpop.f32.mrf.mxu3 }
 0x18b   : > { %v2258_v17 = vpop.eup %2257  ;;  %1714 = vst [vmem:[%s3279_s27] sm:$0xff] %v1650_v26  ;;  %v3283_v32 = vadd.f32 %v3206_v30, %v1191_v31  ;;  %v985_v5 = vmul.f32 %v2256_v27, %v3223_v13 }
 0x18c   : > { %v2260_v33 = vpop.eup %2259  ;;  %2269 = vrcp.f32 %v858_v0  ;;  %v723_v35 = vmul.f32 1.442695, %v636_v28  ;;  %v590_v37 = vpop.f32.mrf.mxu2  ;;  %v1336_v29 = vmul.f32 1.442695, %v1269_v20  ;;  %v827_v40 = vadd.f32 1.0, %v2258_v17 }
 0x18d   : > { %v2262_v41 = vpop.eup %2261  ;;  %v1300_v46 = vsub.f32 0.0, %v3283_v32  ;;  %v3288_v47 = vadd.f32 %v3242_v36, %v590_v37  ;;  %v954_v21 = vmul.f32 %v2260_v33, %v3227_v2  ;;  %2271 = vpow2.f32 %v785_v63  ;;  %v2593_v37 = vld [vmem:[%s2958_s16 + $0x10] sm:$0xff] }
 0x18e   : > { %v2264_v45 = vpop.eup %2263  ;;  %v1460_v50 = vadd.f32 1.0, %v2262_v41  ;;  %v513_v43 = vpop.f32.mrf.mxu0  ;;  %2273 = vpow2.f32 %v723_v35 }
 0x18f   : > { %v2266_v25 = vpop.eup %2265  ;;  %v1587_v53 = vmul.f32 %v2264_v45, %v3230_v22  ;;  %v1398_v54 = vmul.f32 1.442695, %v1300_v46  ;;  %v668_v59 = vsub.f32 0.0, %v3288_v47  ;;  %v1116_v34 = vpop.f32.mrf.mxu1  ;;  %v3294_v2 = vadd.f32 %v3242_v36, %v513_v43  ;;  %v2594_v43 = vld [vmem:[%s2958_s16 + $0x108] sm:$0xff] }
 0x190   : > { %v2268_v58 = vpop.eup %2267  ;;  %2275 = vrcp.f32 %v1460_v50  ;;  %v1491_v38 = vadd.f32 1.0, %v2266_v25  ;;  %v3297_v57 = vadd.f32 %v3206_v30, %v1116_v34  ;;  %v1007_v9 = vpack.c.bf16 %v954_v21, %v953_v42 }
 0x191   : > { %v1651_v62 = vadd.f32 %v2591_v39, %v1587_v53  ;;  %v1618_v22 = vmul.f32 %v2268_v58, %v3235_v3  ;;  %2277 = vpow2.f32 %v1336_v29  ;;  %v787_v51 = vmul.f32 1.442695, %v668_v59 }
 0x192   : > { %v2270_v4 = vpop.eup %2269  ;;  %2279 = vrcp.f32 %v1491_v38  ;;  %v637_v44 = vsub.f32 0.0, %v3294_v2  ;;  %v1270_v6 = vsub.f32 0.0, %v3297_v57  ;;  %v1193_v61 = vpop.f32.mrf.mxu3  ;;  %1155 = vmatmul.bf16.gmra.mxu1 %v1007_v9 }
 0x193   : > { %1715 = vst [vmem:[%s3279_s27 + $0x8] sm:$0xff] %v1651_v62  ;;  %v1682_v55 = vadd.f32 %v2592_v7, %v1618_v22  ;;  %v986_v8 = vmul.f32 %v2270_v4, %v3245_v16  ;;  %2281 = vpow2.f32 %v1398_v54  ;;  %v2272_v3 = vpop.eup %2271  ;;  %v3308_v13 = vadd.f32 %v3206_v30, %v1193_v61 }
 0x194   : > { %2283 = vrcp.f32 %v827_v40  ;;  %v725_v10 = vmul.f32 1.442695, %v637_v44  ;;  %v1338_v11 = vmul.f32 1.442695, %v1270_v6  ;;  %v593_v14 = vpop.f32.mrf.mxu2  ;;  %v2274_v15 = vpop.eup %2273  ;;  %v859_v42 = vadd.f32 1.0, %v2272_v3 }
 0x195   : > { %1746 = vst [vmem:[%s3279_s27 + $0x100] sm:$0xff] %v1682_v55  ;;  %2285 = vpow2.f32 %v787_v51  ;;  %v3312_v56 = vadd.f32 %v3242_v36, %v593_v14  ;;  %v1023_v19 = vpack.c.bf16 %v986_v8, %v985_v5  ;;  %v828_v16 = vadd.f32 1.0, %v2274_v15 }
 0x196   : > { %v2276_v12 = vpop.eup %2275  ;;  %2287 = vpow2.f32 %v725_v10  ;;  %v1301_v60 = vsub.f32 0.0, %v3308_v13  ;;  %v515_v18 = vpop.f32.mrf.mxu0 }
 0x197   : > { %v2278_v26 = vpop.eup %2277  ;;  %v1588_v63 = vmul.f32 %v2276_v12, %v3253_v49  ;;  %2289 = vpow2.f32 %v1338_v11  ;;  %v669_v27 = vsub.f32 0.0, %v3312_v56  ;;  %v3318_v0 = vadd.f32 %v3242_v36, %v515_v18  ;;  %v1118_v28 = vpop.f32.mrf.mxu1 }
 0x198   : > { %v2280_v20 = vpop.eup %2279  ;;  %2291 = vrcp.f32 %v828_v16  ;;  %v1461_v31 = vadd.f32 1.0, %v2278_v26  ;;  %v1400_v17 = vmul.f32 1.442695, %v1301_v60  ;;  %v3321_v33 = vadd.f32 %v3206_v30, %v1118_v28  ;;  %1235 = vmatmul.bf16.gmra.mxu3 %v1023_v19  ;;  %v2595_v26 = vld [vmem:[%s2958_s16 + $0x18] sm:$0xff] }
 0x199   : > { %v2282_v35 = vpop.eup %2281  ;;  %v1652_v49 = vadd.f32 %v2593_v37, %v1588_v63  ;;  %v1619_v41 = vmul.f32 %v2280_v20, %v3259_v1  ;;  %v638_v29 = vsub.f32 0.0, %v3318_v0  ;;  %v789_v53 = vmul.f32 1.442695, %v669_v27  ;;  %v2596_v37 = vld [vmem:[%s2958_s16 + $0x110] sm:$0xff] }
 0x19a   : > { %v2284_v46 = vpop.eup %2283  ;;  %2293 = vrcp.f32 %v1461_v31  ;;  %v1492_v45 = vadd.f32 1.0, %v2282_v35  ;;  %v1271_v21 = vsub.f32 0.0, %v3321_v33  ;;  %v1196_v40 = vpop.f32.mrf.mxu3 }
 0x19b   : > { %v2286_v50 = vpop.eup %2285  ;;  %1716 = vst [vmem:[%s3279_s27 + $0x10] sm:$0xff] %v1652_v49  ;;  %v1683_v25 = vadd.f32 %v2594_v43, %v1619_v41  ;;  %2295 = vpow2.f32 %v1400_v17  ;;  %v3330_v1 = vadd.f32 %v3206_v30, %v1196_v40  ;;  %v955_v38 = vmul.f32 %v2284_v46, %v3250_v48 }
 0x19c   : > { %v2288_v54 = vpop.eup %2287  ;;  %2297 = vrcp.f32 %v1492_v45  ;;  %v860_v59 = vadd.f32 1.0, %v2286_v50  ;;  %v595_v34 = vpop.f32.mrf.mxu2  ;;  %v727_v39 = vmul.f32 1.442695, %v638_v29  ;;  %v1340_v4 = vmul.f32 1.442695, %v1271_v21 }
 0x19d   : > { %v2290_v58 = vpop.eup %2289  ;;  %1747 = vst [vmem:[%s3279_s27 + $0x108] sm:$0xff] %v1683_v25  ;;  %2299 = vrcp.f32 %v859_v42  ;;  %v3335_v62 = vadd.f32 %v3242_v36, %v595_v34  ;;  %v1302_v5 = vsub.f32 0.0, %v3330_v1  ;;  %v829_v8 = vadd.f32 1.0, %v2288_v54  ;;  %v2597_v34 = vld [vmem:[%s2958_s16 + $0x20] sm:$0xff] }
 0x19e   : > { %v2292_v22 = vpop.eup %2291  ;;  %2301 = vrcp.f32 %v860_v59  ;;  %v1462_v51 = vadd.f32 1.0, %v2290_v58  ;;  %v518_v44 = vpop.f32.mrf.mxu0 }
 0x19f   : > { %v956_v6 = vmul.f32 %v2292_v22, %v3269_v23  ;;  %2303 = vpow2.f32 %v789_v53  ;;  %v670_v61 = vsub.f32 0.0, %v3335_v62  ;;  %v3341_v48 = vadd.f32 %v3242_v36, %v518_v44  ;;  %v1121_v7 = vpop.f32.mrf.mxu1 }
 0x1a0   : > { %v2294_v55 = vpop.eup %2293  ;;  %2305 = vrcp.f32 %v1462_v51  ;;  %v1402_v9 = vmul.f32 1.442695, %v1302_v5  ;;  %v3344_v3 = vadd.f32 %v3206_v30, %v1121_v7 }
 0x1a1   : > { %v2296_v10 = vpop.eup %2295  ;;  %v1589_v11 = vmul.f32 %v2294_v55, %v3272_v24  ;;  %2307 = vpow2.f32 %v727_v39  ;;  %v791_v23 = vmul.f32 1.442695, %v670_v61  ;;  %v639_v14 = vsub.f32 0.0, %v3341_v48 }
 0x1a2   : > { %v2298_v15 = vpop.eup %2297  ;;  %v1493_v19 = vadd.f32 1.0, %v2296_v10  ;;  %2309 = vpow2.f32 %v1340_v4  ;;  %v1272_v12 = vsub.f32 0.0, %v3344_v3  ;;  %v1008_v16 = vpack.c.bf16 %v956_v6, %v955_v38  ;;  %v1198_v60 = vpop.f32.mrf.mxu3 }
 0x1a3   : > { %v2300_v18 = vpop.eup %2299  ;;  %v1653_v63 = vadd.f32 %v2595_v26, %v1589_v11  ;;  %v1620_v27 = vmul.f32 %v2298_v15, %v3283_v32  ;;  %2311 = vpow2.f32 %v1402_v9  ;;  %v729_v24 = vmul.f32 1.442695, %v639_v14 }
 0x1a4   : > { %v2302_v28 = vpop.eup %2301  ;;  %2313 = vrcp.f32 %v1493_v19  ;;  %v1342_v20 = vmul.f32 1.442695, %v1272_v12  ;;  %v3352_v31 = vadd.f32 %v3206_v30, %v1198_v60  ;;  %v598_v17 = vpop.f32.mrf.mxu2  ;;  %1160 = vmatmul.bf16.gmra.mxu1 %v1008_v16  ;;  %v987_v53 = vmul.f32 %v2300_v18, %v3264_v52 }
 0x1a5   : > { %v2304_v35 = vpop.eup %2303  ;;  %1717 = vst [vmem:[%s3279_s27 + $0x18] sm:$0xff] %v1653_v63  ;;  %v1684_v49 = vadd.f32 %v2596_v37, %v1620_v27  ;;  %2315 = vpow2.f32 %v791_v23  ;;  %v3357_v41 = vadd.f32 %v3242_v36, %v598_v17  ;;  %v988_v42 = vmul.f32 %v2302_v28, %v3288_v47  ;;  %v2598_v23 = vld [vmem:[%s2958_s16 + $0x118] sm:$0xff] }
 0x1a6   : > { %v2306_v32 = vpop.eup %2305  ;;  %2317 = vrcp.f32 %v829_v8  ;;  %v1303_v29 = vsub.f32 0.0, %v3352_v31  ;;  %v520_v46 = vpop.f32.mrf.mxu0  ;;  %v861_v8 = vadd.f32 1.0, %v2304_v35 }
 0x1a7   : > { %v2308_v45 = vpop.eup %2307  ;;  %1748 = vst [vmem:[%s3279_s27 + $0x110] sm:$0xff] %v1684_v49  ;;  %v1590_v21 = vmul.f32 %v2306_v32, %v3297_v57  ;;  %2319 = vpow2.f32 %v729_v24  ;;  %v671_v40 = vsub.f32 0.0, %v3357_v41  ;;  %v3365_v50 = vadd.f32 %v3242_v36, %v520_v46  ;;  %v1123_v43 = vpop.f32.mrf.mxu1 }
 0x1a8   : > { %v2310_v25 = vpop.eup %2309  ;;  %v830_v47 = vadd.f32 1.0, %v2308_v45  ;;  %2321 = vpow2.f32 %v1342_v20  ;;  %v3369_v54 = vadd.f32 %v3206_v30, %v1123_v43  ;;  %v1404_v38 = vmul.f32 1.442695, %v1303_v29 }
 0x1a9   : > { %v2312_v59 = vpop.eup %2311  ;;  %v1654_v58 = vadd.f32 %v2597_v34, %v1590_v21  ;;  %v1463_v57 = vadd.f32 1.0, %v2310_v25  ;;  %v793_v39 = vmul.f32 1.442695, %v671_v40  ;;  %v640_v4 = vsub.f32 0.0, %v3365_v50  ;;  %v2599_v25 = vld [vmem:[%s2958_s16 + $0x28] sm:$0xff] }
 0x1aa   : > { %v2314_v22 = vpop.eup %2313  ;;  %2323 = vrcp.f32 %v830_v47  ;;  %v1494_v51 = vadd.f32 1.0, %v2312_v59  ;;  %v1024_v5 = vpack.c.bf16 %v988_v42, %v987_v53  ;;  %v1201_v52 = vpop.f32.mrf.mxu3  ;;  %v1273_v61 = vsub.f32 0.0, %v3369_v54 }
 0x1ab   : > { %v2316_v44 = vpop.eup %2315  ;;  %1718 = vst [vmem:[%s3279_s27 + $0x20] sm:$0xff] %v1654_v58  ;;  %v1621_v6 = vmul.f32 %v2314_v22, %v3308_v13  ;;  %2325 = vrcp.f32 %v1463_v57  ;;  %v3377_v7 = vadd.f32 %v3206_v30, %v1201_v52  ;;  %v731_v19 = vmul.f32 1.442695, %v640_v4  ;;  %v2600_v58 = vld [vmem:[%s2958_s16 + $0x120] sm:$0xff] }
 0x1ac   : > { %v2318_v55 = vpop.eup %2317  ;;  %2327 = vrcp.f32 %v1494_v51  ;;  %v862_v9 = vadd.f32 1.0, %v2316_v44  ;;  %1240 = vmatmul.bf16.gmra.mxu3 %v1024_v5  ;;  %v600_v10 = vpop.f32.mrf.mxu2  ;;  %v1344_v18 = vmul.f32 1.442695, %v1273_v61 }
 0x1ad   : > { %v2320_v11 = vpop.eup %2319  ;;  %v1685_v14 = vadd.f32 %v2598_v23, %v1621_v6  ;;  %2329 = vpow2.f32 %v1404_v38  ;;  %v1304_v15 = vsub.f32 0.0, %v3377_v7  ;;  %v3382_v12 = vadd.f32 %v3242_v36, %v600_v10 }
 0x1ae   : > { %v2322_v13 = vpop.eup %2321  ;;  %2331 = vrcp.f32 %v862_v9  ;;  %v523_v16 = vpop.f32.mrf.mxu0  ;;  %v957_v35 = vmul.f32 %v2318_v55, %v3294_v2  ;;  %v831_v47 = vadd.f32 1.0, %v2320_v11 }
 0x1af   : > { %1749 = vst [vmem:[%s3279_s27 + $0x118] sm:$0xff] %v1685_v14  ;;  %v1464_v60 = vadd.f32 1.0, %v2322_v13  ;;  %2333 = vpow2.f32 %v793_v39  ;;  %v3386_v26 = vadd.f32 %v3242_v36, %v523_v16  ;;  %v1126_v63 = vpop.f32.mrf.mxu1  ;;  %v1406_v24 = vmul.f32 1.442695, %v1304_v15  ;;  %v2601_v15 = vld [vmem:[%s2958_s16 + $0x30] sm:$0xff] }
 0x1b0   : > { %v2324_v27 = vpop.eup %2323  ;;  %2335 = vrcp.f32 %v861_v8  ;;  %v672_v28 = vsub.f32 0.0, %v3382_v12  ;;  %v3390_v20 = vadd.f32 %v3206_v30, %v1126_v63 }
 0x1b1   : > { %v2326_v17 = vpop.eup %2325  ;;  %v958_v37 = vmul.f32 %v2324_v27, %v3318_v0  ;;  %2337 = vrcp.f32 %v1464_v60  ;;  %v641_v49 = vsub.f32 0.0, %v3386_v26 }
 0x1b2   : > { %v2328_v32 = vpop.eup %2327  ;;  %v1591_v42 = vmul.f32 %v2326_v17, %v3321_v33  ;;  %2339 = vpow2.f32 %v731_v19  ;;  %v795_v29 = vmul.f32 1.442695, %v672_v28  ;;  %v1274_v46 = vsub.f32 0.0, %v3390_v20  ;;  %v1203_v45 = vpop.f32.mrf.mxu3 }
 0x1b3   : > { %v2330_v21 = vpop.eup %2329  ;;  %v1622_v40 = vmul.f32 %v2328_v32, %v3330_v1  ;;  %2341 = vpow2.f32 %v1344_v18  ;;  %v733_v2 = vmul.f32 1.442695, %v641_v49  ;;  %v1009_v43 = vpack.c.bf16 %v958_v37, %v957_v35 }
 0x1b4   : > { %v2332_v0 = vpop.eup %2331  ;;  %v1655_v53 = vadd.f32 %v2599_v25, %v1591_v42  ;;  %v1495_v59 = vadd.f32 1.0, %v2330_v21  ;;  %2343 = vpow2.f32 %v1406_v24  ;;  %v603_v33 = vpop.f32.mrf.mxu2  ;;  %v1346_v38 = vmul.f32 1.442695, %v1274_v46 }
 0x1b5   : > { %v2334_v34 = vpop.eup %2333  ;;  %v1686_v57 = vadd.f32 %v2600_v58, %v1622_v40  ;;  %2345 = vpow2.f32 %v795_v29  ;;  %1165 = vmatmul.bf16.gmra.mxu1 %v1009_v43  ;;  %v3401_v1 = vadd.f32 %v3206_v30, %v1203_v45  ;;  %v3405_v51 = vadd.f32 %v3242_v36, %v603_v33 }
 0x1b6   : > { %v2336_v39 = vpop.eup %2335  ;;  %1719 = vst [vmem:[%s3279_s27 + $0x28] sm:$0xff] %v1655_v53  ;;  %2347 = vrcp.f32 %v1495_v59  ;;  %v863_v22 = vadd.f32 1.0, %v2334_v34  ;;  %v525_v4 = vpop.f32.mrf.mxu0  ;;  %v990_v52 = vmul.f32 %v2332_v0, %v3335_v62 }
 0x1b7   : > { %v2338_v5 = vpop.eup %2337  ;;  %1750 = vst [vmem:[%s3279_s27 + $0x120] sm:$0xff] %v1686_v57  ;;  %2349 = vpow2.f32 %v733_v2  ;;  %v1305_v44 = vsub.f32 0.0, %v3401_v1  ;;  %v3411_v6 = vadd.f32 %v3242_v36, %v525_v4  ;;  %v1128_v61 = vpop.f32.mrf.mxu1  ;;  %v989_v11 = vmul.f32 %v2336_v39, %v3312_v56  ;;  %v2602_v2 = vld [vmem:[%s2958_s16 + $0x128] sm:$0xff] }
 0x1b8   : > { %v2340_v55 = vpop.eup %2339  ;;  %2351 = vrcp.f32 %v831_v47  ;;  %v1592_v8 = vmul.f32 %v2338_v5, %v3344_v3  ;;  %v3415_v9 = vadd.f32 %v3206_v30, %v1128_v61  ;;  %v673_v62 = vsub.f32 0.0, %v3405_v51 }
 0x1b9   : > { %v2342_v10 = vpop.eup %2341  ;;  %v832_v23 = vadd.f32 1.0, %v2340_v55  ;;  %2353 = vpow2.f32 %v1346_v38  ;;  %v1408_v16 = vmul.f32 1.442695, %v1305_v44  ;;  %v642_v63 = vsub.f32 0.0, %v3411_v6 }
 0x1ba   : > { %v2344_v14 = vpop.eup %2343  ;;  %v1656_v13 = vadd.f32 %v2601_v15, %v1592_v8  ;;  %2355 = vrcp.f32 %v863_v22  ;;  %v1465_v19 = vadd.f32 1.0, %v2342_v10  ;;  %v1206_v60 = vpop.f32.mrf.mxu3  ;;  %v1025_v27 = vpack.c.bf16 %v990_v52, %v989_v11 }
 0x1bb   : > { %v2346_v18 = vpop.eup %2345  ;;  %2357 = vrcp.f32 %v832_v23  ;;  %v1496_v3 = vadd.f32 1.0, %v2344_v14  ;;  %v1275_v28 = vsub.f32 0.0, %v3415_v9  ;;  %v3424_v17 = vadd.f32 %v3206_v30, %v1206_v60  ;;  %v2603_v14 = vld [vmem:[%s2958_s16 + $0x38] sm:$0xff] }
 0x1bc   : > { %v2348_v24 = vpop.eup %2347  ;;  %1720 = vst [vmem:[%s3279_s27 + $0x30] sm:$0xff] %v1656_v13  ;;  %2359 = vrcp.f32 %v1465_v19  ;;  %v864_v56 = vadd.f32 1.0, %v2346_v18  ;;  %v605_v35 = vpop.f32.mrf.mxu2  ;;  %v797_v32 = vmul.f32 1.442695, %v673_v62  ;;  %1245 = vmatmul.bf16.gmra.mxu3 %v1025_v27  ;;  %v735_v0 = vmul.f32 1.442695, %v642_v63 }
 0x1bd   : > { %v2350_v37 = vpop.eup %2349  ;;  %v1623_v49 = vmul.f32 %v2348_v24, %v3352_v31  ;;  %2361 = vrcp.f32 %v1496_v3  ;;  %v3428_v42 = vadd.f32 %v3242_v36, %v605_v35  ;;  %v1306_v45 = vsub.f32 0.0, %v3424_v17 }
 0x1be   : > { %v2352_v29 = vpop.eup %2351  ;;  %2363 = vrcp.f32 %v864_v56  ;;  %v833_v46 = vadd.f32 1.0, %v2350_v37  ;;  %v528_v21 = vpop.f32.mrf.mxu0  ;;  %v1348_v59 = vmul.f32 1.442695, %v1275_v28 }
 0x1bf   : > { %v2354_v40 = vpop.eup %2353  ;;  %v1687_v43 = vadd.f32 %v2602_v2, %v1623_v49  ;;  %2365 = vpow2.f32 %v1408_v16  ;;  %v674_v31 = vsub.f32 0.0, %v3428_v42  ;;  %v1131_v25 = vpop.f32.mrf.mxu1  ;;  %v3434_v33 = vadd.f32 %v3242_v36, %v528_v21  ;;  %v2604_v16 = vld [vmem:[%s2958_s16 + $0x130] sm:$0xff] }
 0x1c0   : > { %v2356_v53 = vpop.eup %2355  ;;  %2367 = vrcp.f32 %v833_v46  ;;  %v1466_v47 = vadd.f32 1.0, %v2354_v40  ;;  %v959_v58 = vmul.f32 %v2352_v29, %v3341_v48  ;;  %v1410_v57 = vmul.f32 1.442695, %v1306_v45 }
 0x1c1   : > { %v2358_v34 = vpop.eup %2357  ;;  %1751 = vst [vmem:[%s3279_s27 + $0x128] sm:$0xff] %v1687_v43  ;;  %2369 = vpow2.f32 %v797_v32  ;;  %v3439_v38 = vadd.f32 %v3206_v30, %v1131_v25  ;;  %v799_v4 = vmul.f32 1.442695, %v674_v31  ;;  %v643_v5 = vsub.f32 0.0, %v3434_v33 }
 0x1c2   : > { %v2360_v39 = vpop.eup %2359  ;;  %v960_v22 = vmul.f32 %v2358_v34, %v3365_v50  ;;  %2371 = vrcp.f32 %v1466_v47  ;;  %v1208_v52 = vpop.f32.mrf.mxu3  ;;  %v991_v27 = vmul.f32 %v2356_v53, %v3357_v41 }
 0x1c3   : > { %v2362_v44 = vpop.eup %2361  ;;  %v1593_v61 = vmul.f32 %v2360_v39, %v3369_v54  ;;  %2373 = vpow2.f32 %v735_v0  ;;  %v1276_v48 = vsub.f32 0.0, %v3439_v38  ;;  %v3446_v55 = vadd.f32 %v3206_v30, %v1208_v52  ;;  %v2605_v0 = vld [vmem:[%s2958_s16 + $0x40] sm:$0xff] }
 0x1c4   : > { %v2364_v8 = vpop.eup %2363  ;;  %v1624_v10 = vmul.f32 %v2362_v44, %v3377_v7  ;;  %2375 = vpow2.f32 %v1348_v59  ;;  %v737_v50 = vmul.f32 1.442695, %v643_v5  ;;  %v1010_v11 = vpack.c.bf16 %v960_v22, %v959_v58  ;;  %v608_v23 = vpop.f32.mrf.mxu2 }
 0x1c5   : > { %v2366_v62 = vpop.eup %2365  ;;  %v1657_v15 = vadd.f32 %v2603_v14, %v1593_v61  ;;  %v992_v54 = vmul.f32 %v2364_v8, %v3382_v12  ;;  %2377 = vpow2.f32 %v1410_v57  ;;  %v1350_v13 = vmul.f32 1.442695, %v1276_v48 }
 0x1c6   : > { %v2368_v19 = vpop.eup %2367  ;;  %v1688_v60 = vadd.f32 %v2604_v16, %v1624_v10  ;;  %v1497_v18 = vadd.f32 1.0, %v2366_v62  ;;  %2379 = vpow2.f32 %v799_v4  ;;  %1170 = vmatmul.bf16.gmra.mxu1 %v1010_v11  ;;  %v1307_v7 = vsub.f32 0.0, %v3446_v55  ;;  %v530_v3 = vpop.f32.mrf.mxu0  ;;  %v2606_v62 = vld [vmem:[%s2958_s16 + $0x138] sm:$0xff] }
 0x1c7   : > { %v2370_v63 = vpop.eup %2369  ;;  %1721 = vst [vmem:[%s3279_s27 + $0x38] sm:$0xff] %v1657_v15  ;;  %2381 = vpow2.f32 %v737_v50  ;;  %v3456_v24 = vadd.f32 %v3242_v36, %v608_v23  ;;  %v3459_v12 = vadd.f32 %v3242_v36, %v530_v3  ;;  %v1133_v56 = vpop.f32.mrf.mxu1  ;;  %v1026_v40 = vpack.c.bf16 %v992_v54, %v991_v27 }
 0x1c8   : > { %v2372_v28 = vpop.eup %2371  ;;  %1752 = vst [vmem:[%s3279_s27 + $0x130] sm:$0xff] %v1688_v60  ;;  %2383 = vrcp.f32 %v1497_v18  ;;  %v865_v35 = vadd.f32 1.0, %v2370_v63  ;;  %v1412_v37 = vmul.f32 1.442695, %v1307_v7  ;;  %v3463_v49 = vadd.f32 %v3206_v30, %v1133_v56 }
 0x1c9   : > { %v2374_v32 = vpop.eup %2373  ;;  %v1594_v41 = vmul.f32 %v2372_v28, %v3390_v20  ;;  %2385 = vpow2.f32 %v1350_v13  ;;  %v675_v29 = vsub.f32 0.0, %v3456_v24  ;;  %v644_v21 = vsub.f32 0.0, %v3459_v12 }
 0x1ca   : > { %v2376_v46 = vpop.eup %2375  ;;  %2387 = vrcp.f32 %v865_v35  ;;  %v834_v45 = vadd.f32 1.0, %v2374_v32  ;;  %v1211_v2 = vpop.f32.mrf.mxu3  ;;  %v1277_v59 = vsub.f32 0.0, %v3463_v49  ;;  %v961_v23 = vmul.f32 %v2368_v19, %v3386_v26  ;;  %v3491_v26 = vld [vmem:[%s3828_s4] ss:$0 sm:$0xff] }
 0x1cb   : > { %v2378_v43 = vpop.eup %2377  ;;  %v1658_v31 = vadd.f32 %v2605_v0, %v1594_v41  ;;  %v1467_v25 = vadd.f32 1.0, %v2376_v46  ;;  %2389 = vpow2.f32 %v1412_v37  ;;  %v801_v20 = vmul.f32 1.442695, %v675_v29  ;;  %v2608_v37 = vld [vmem:[%s2958_s16 + $0x48] sm:$0xff] }
 0x1cc   : > { %v2380_v53 = vpop.eup %2379  ;;  %2391 = vrcp.f32 %v834_v45  ;;  %v1498_v47 = vadd.f32 1.0, %v2378_v43  ;;  %v610_v34 = vpop.f32.mrf.mxu2  ;;  %1250 = vmatmul.bf16.gmra.mxu3 %v1026_v40  ;;  %v3472_v39 = vadd.f32 %v3206_v30, %v1211_v2  ;;  %v739_v5 = vmul.f32 1.442695, %v644_v21  ;;  %v2609_v45 = vld [vmem:[%s2958_s16 + $0x140] sm:$0xff] }
 0x1cd   : > { %v2382_v58 = vpop.eup %2381  ;;  %1722 = vst [vmem:[%s3279_s27 + $0x40] sm:$0xff] %v1658_v31  ;;  %2393 = vrcp.f32 %v1467_v25  ;;  %v866_v57 = vadd.f32 1.0, %v2380_v53  ;;  %v3475_v22 = vadd.f32 %v3242_v36, %v610_v34  ;;  %v1352_v15 = vmul.f32 1.442695, %v1277_v59  ;;  %v2610_v59 = vld [vmem:[%s2958_s16 + $0x50] sm:$0xff] }
 0x1ce   : > { %v2384_v4 = vpop.eup %2383  ;;  %2395 = vrcp.f32 %v1498_v47  ;;  %v1308_v61 = vsub.f32 0.0, %v3472_v39  ;;  %v835_v29 = vadd.f32 1.0, %v2382_v58 }
 0x1cf   : > { %v2386_v52 = vpop.eup %2385  ;;  %v1625_v44 = vmul.f32 %v2384_v4, %v3401_v1  ;;  %2397 = vrcp.f32 %v866_v57  ;;  %v676_v48 = vsub.f32 0.0, %v3475_v22  ;;  %v1136_v8 = vpop.f32.mrf.mxu1 }
 0x1d0   : > { %v2388_v10 = vpop.eup %2387  ;;  %v1468_v50 = vadd.f32 1.0, %v2386_v52  ;;  %v3481_v11 = vadd.f32 %v3206_v30, %v1136_v8  ;;  %2399 = vpow2.f32 %v801_v20  ;;  %v1414_v13 = vmul.f32 1.442695, %v1308_v61 }
 0x1d1   : > { %v2390_v36 = vpop.eup %2389  ;;  %v1689_v14 = vadd.f32 %v2606_v62, %v1625_v44  ;;  %v803_v7 = vmul.f32 1.442695, %v676_v48  ;;  %v2611_v44 = vld [vmem:[%s2958_s16 + $0x148] sm:$0xff] }
 0x1d2   : > { %v2392_v1 = vpop.eup %2391  ;;  %2401 = vrcp.f32 %v1468_v50  ;;  %v1499_v54 = vadd.f32 1.0, %v2390_v36  ;;  %v1278_v16 = vsub.f32 0.0, %v3481_v11  ;;  %v1213_v60 = vpop.f32.mrf.mxu3 }
 0x1d3   : > { %v2394_v18 = vpop.eup %2393  ;;  %1753 = vst [vmem:[%s3279_s27 + $0x138] sm:$0xff] %v1689_v14  ;;  %v962_v30 = vmul.f32 %v2392_v1, %v3411_v6  ;;  %2403 = vpow2.f32 %v739_v5  ;;  %v3494_v19 = vadd.f32 %v3491_v26, %v1213_v60 }
 0x1d4   : > { %v2396_v3 = vpop.eup %2395  ;;  %v1595_v63 = vmul.f32 %v2394_v18, %v3415_v9  ;;  %2405 = vrcp.f32 %v1499_v54  ;;  %v1354_v27 = vmul.f32 1.442695, %v1278_v16  ;;  %v993_v9 = vmul.f32 %v2388_v10, %v3405_v51 }
 0x1d5   : > { %v2398_v56 = vpop.eup %2397  ;;  %v1626_v28 = vmul.f32 %v2396_v3, %v3424_v17  ;;  %2407 = vpow2.f32 %v1352_v15  ;;  %v1011_v6 = vpack.c.bf16 %v962_v30, %v961_v23  ;;  %v1309_v35 = vsub.f32 0.0, %v3494_v19 }
 0x1d6   : > { %v1659_v32 = vadd.f32 %v2608_v37, %v1595_v63  ;;  %v994_v41 = vmul.f32 %v2398_v56, %v3428_v42  ;;  %2409 = vpow2.f32 %v1414_v13  ;;  %v2400_v46 = vpop.eup %2399 }
 0x1d7   : > { %v1690_v21 = vadd.f32 %v2609_v45, %v1626_v28  ;;  %2411 = vpow2.f32 %v803_v7  ;;  %1175 = vmatmul.bf16.gmra.mxu1 %v1011_v6  ;;  %v1416_v17 = vmul.f32 1.442695, %v1309_v35  ;;  %v1138_v40 = vpop.f32.mrf.mxu1  ;;  %v867_v31 = vadd.f32 1.0, %v2400_v46 }
 0x1d8   : > { %v2402_v2 = vpop.eup %2401  ;;  %1723 = vst [vmem:[%s3279_s27 + $0x48] sm:$0xff] %v1659_v32  ;;  %2413 = vpow2.f32 %v1354_v27  ;;  %v3505_v43 = vadd.f32 %v3491_v26, %v1138_v40  ;;  %v1027_v51 = vpack.c.bf16 %v994_v41, %v993_v9  ;;  %v2612_v41 = vld [vmem:[%s2958_s16 + $0x58] sm:$0xff] }
 0x1d9   : > { %v2404_v42 = vpop.eup %2403  ;;  %1754 = vst [vmem:[%s3279_s27 + $0x140] sm:$0xff] %v1690_v21  ;;  %v1596_v0 = vmul.f32 %v2402_v2, %v3439_v38  ;;  %2415 = vpow2.f32 %v1416_v17  ;;  %v2613_v21 = vld [vmem:[%s2958_s16 + $0x150] sm:$0xff] }
 0x1da   : > { %v2406_v25 = vpop.eup %2405  ;;  %2417 = vrcp.f32 %v835_v29  ;;  %v836_v53 = vadd.f32 1.0, %v2404_v42  ;;  %v1216_v47 = vpop.f32.mrf.mxu3  ;;  %v1279_v57 = vsub.f32 0.0, %v3505_v43 }
 0x1db   : > { %v2408_v20 = vpop.eup %2407  ;;  %v1660_v34 = vadd.f32 %v2610_v59, %v1596_v0  ;;  %v1627_v58 = vmul.f32 %v2406_v25, %v3446_v55  ;;  %v3513_v4 = vadd.f32 %v3491_v26, %v1216_v47  ;;  %v2614_v0 = vld [vmem:[%s2958_s16 + $0x60] sm:$0xff] }
 0x1dc   : > { %v2410_v38 = vpop.eup %2409  ;;  %2419 = vrcp.f32 %v836_v53  ;;  %v1469_v5 = vadd.f32 1.0, %v2408_v20  ;;  %1255 = vmatmul.bf16.gmra.mxu3 %v1027_v51  ;;  %v1356_v23 = vmul.f32 1.442695, %v1279_v57 }
 0x1dd   : > { %v2412_v52 = vpop.eup %2411  ;;  %1724 = vst [vmem:[%s3279_s27 + $0x50] sm:$0xff] %v1660_v34  ;;  %v1691_v61 = vadd.f32 %v2611_v44, %v1627_v58  ;;  %2421 = vrcp.f32 %v867_v31  ;;  %v1500_v48 = vadd.f32 1.0, %v2410_v38  ;;  %v1310_v8 = vsub.f32 0.0, %v3513_v4 }
 0x1de   : > { %v2414_v10 = vpop.eup %2413  ;;  %2423 = vrcp.f32 %v1469_v5  ;;  %v868_v55 = vadd.f32 1.0, %v2412_v52 }
 0x1df   : > { %v2416_v50 = vpop.eup %2415  ;;  %1755 = vst [vmem:[%s3279_s27 + $0x148] sm:$0xff] %v1691_v61  ;;  %2425 = vrcp.f32 %v1500_v48  ;;  %v1470_v36 = vadd.f32 1.0, %v2414_v10  ;;  %v1141_v62 = vpop.f32.mrf.mxu1  ;;  %v1418_v1 = vmul.f32 1.442695, %v1310_v8 }
 0x1e0   : > { %v2418_v14 = vpop.eup %2417  ;;  %2427 = vrcp.f32 %v868_v55  ;;  %v1501_v15 = vadd.f32 1.0, %v2416_v50  ;;  %v3520_v54 = vadd.f32 %v3491_v26, %v1141_v62 }
 0x1e1   : > { %2429 = vrcp.f32 %v1470_v36  ;;  %v963_v30 = vmul.f32 %v2418_v14, %v3434_v33 }
 0x1e2   : > { %v2420_v13 = vpop.eup %2419  ;;  %2431 = vrcp.f32 %v1501_v15  ;;  %v1280_v16 = vsub.f32 0.0, %v3520_v54  ;;  %v1218_v60 = vpop.f32.mrf.mxu3 }
 0x1e3   : > { %v2422_v18 = vpop.eup %2421  ;;  %v964_v7 = vmul.f32 %v2420_v13, %v3459_v12  ;;  %2433 = vpow2.f32 %v1356_v23  ;;  %v3526_v3 = vadd.f32 %v3491_v26, %v1218_v60 }
 0x1e4   : > { %v2424_v63 = vpop.eup %2423  ;;  %2435 = vpow2.f32 %v1418_v1  ;;  %v1358_v27 = vmul.f32 1.442695, %v1280_v16  ;;  %v995_v32 = vmul.f32 %v2422_v18, %v3456_v24  ;;  %v2616_v1 = vld [vmem:[%s2958_s16 + $0x68] sm:$0xff]  ;;  %v2617_v18 = vld [vmem:[%s2958_s16 + $0x160] sm:$0xff] }
 0x1e5   : > { %v2426_v56 = vpop.eup %2425  ;;  %v1597_v28 = vmul.f32 %v2424_v63, %v3463_v49  ;;  %v1012_v6 = vpack.c.bf16 %v964_v7, %v963_v30  ;;  %v1311_v35 = vsub.f32 0.0, %v3526_v3 }
 0x1e6   : > { %v2428_v37 = vpop.eup %2427  ;;  %v1628_v33 = vmul.f32 %v2426_v56, %v3472_v39  ;;  %2437 = vpow2.f32 %v1358_v27  ;;  %v2618_v56 = vld [vmem:[%s2958_s16 + $0x70] sm:$0xff] }
 0x1e7   : > { %v2430_v12 = vpop.eup %2429  ;;  %v1661_v29 = vadd.f32 %v2612_v41, %v1597_v28  ;;  %v996_v46 = vmul.f32 %v2428_v37, %v3475_v22  ;;  %1180 = vmatmul.bf16.gmra.mxu1 %v1012_v6  ;;  %v1420_v9 = vmul.f32 1.442695, %v1311_v35  ;;  %v1143_v49 = vpop.f32.mrf.mxu1 }
 0x1e8   : > { %v2432_v45 = vpop.eup %2431  ;;  %v1692_v17 = vadd.f32 %v2613_v21, %v1628_v33  ;;  %v1598_v39 = vmul.f32 %v2430_v12, %v3481_v11  ;;  %v3537_v40 = vadd.f32 %v3491_v26, %v1143_v49  ;;  %v2615_v11 = vld [vmem:[%s2958_s16 + $0x158] sm:$0xff]  ;;  %v2619_v12 = vld [vmem:[%s2958_s16 + $0x168] sm:$0xff] }
 0x1e9   : > { %v2434_v2 = vpop.eup %2433  ;;  %1725 = vst [vmem:[%s3279_s27 + $0x58] sm:$0xff] %v1661_v29  ;;  %v1629_v24 = vmul.f32 %v2432_v45, %v3494_v19  ;;  %2439 = vpow2.f32 %v1420_v9  ;;  %v1028_v22 = vpack.c.bf16 %v996_v46, %v995_v32 }
 0x1ea   : > { %v2436_v42 = vpop.eup %2435  ;;  %1756 = vst [vmem:[%s3279_s27 + $0x150] sm:$0xff] %v1692_v17  ;;  %v1662_v31 = vadd.f32 %v2614_v0, %v1598_v39  ;;  %v1471_v51 = vadd.f32 1.0, %v2434_v2  ;;  %v1281_v25 = vsub.f32 0.0, %v3537_v40  ;;  %v1221_v53 = vpop.f32.mrf.mxu3 }
 0x1eb   : > { %v1693_v47 = vadd.f32 %v2615_v11, %v1629_v24  ;;  %v1502_v20 = vadd.f32 1.0, %v2436_v42  ;;  %v3546_v59 = vadd.f32 %v3491_v26, %v1221_v53  ;;  %v2620_v24 = vld [vmem:[%s2958_s16 + $0x78] sm:$0xff] }
 0x1ec   : > { %v2438_v34 = vpop.eup %2437  ;;  %1726 = vst [vmem:[%s3279_s27 + $0x60] sm:$0xff] %v1662_v31  ;;  %2441 = vrcp.f32 %v1471_v51  ;;  %v1360_v19 = vmul.f32 1.442695, %v1281_v25  ;;  %1260 = vmatmul.bf16.gmra.mxu3 %v1028_v22  ;;  %v2621_v25 = vld [vmem:[%s2958_s16 + $0x170] sm:$0xff] }
 0x1ed   : > { %1757 = vst [vmem:[%s3279_s27 + $0x158] sm:$0xff] %v1693_v47  ;;  %2443 = vrcp.f32 %v1502_v20  ;;  %v1472_v58 = vadd.f32 1.0, %v2438_v34  ;;  %v1312_v57 = vsub.f32 0.0, %v3546_v59 }
 0x1ee   : > { %2445 = vpow2.f32 %v1360_v19 }
 0x1ef   : > { %v2440_v38 = vpop.eup %2439  ;;  %2447 = vrcp.f32 %v1472_v58  ;;  %v1422_v5 = vmul.f32 1.442695, %v1312_v57  ;;  %v1146_v52 = vpop.f32.mrf.mxu1 }
 0x1f0   : > { %v1503_v44 = vadd.f32 1.0, %v2440_v38  ;;  %v3552_v61 = vadd.f32 %v3491_v26, %v1146_v52 }
 0x1f1   : > { %2449 = vpow2.f32 %v1422_v5 }
 0x1f2   : > { %v2442_v48 = vpop.eup %2441  ;;  %2451 = vrcp.f32 %v1503_v44  ;;  %v1282_v8 = vsub.f32 0.0, %v3552_v61  ;;  %v1223_v10 = vpop.f32.mrf.mxu3  ;;  %v2622_v44 = vld [vmem:[%s2958_s16 + $0x80] sm:$0xff] }
 0x1f3   : > { %v2444_v55 = vpop.eup %2443  ;;  %v1599_v50 = vmul.f32 %v2442_v48, %v3505_v43  ;;  %v3557_v36 = vadd.f32 %v3491_v26, %v1223_v10 }
 0x1f4   : > { %v2446_v23 = vpop.eup %2445  ;;  %v1630_v62 = vmul.f32 %v2444_v55, %v3513_v4  ;;  %v1362_v14 = vmul.f32 1.442695, %v1282_v8 }
 0x1f5   : > { %v2448_v15 = vpop.eup %2447  ;;  %v1663_v13 = vadd.f32 %v2616_v1, %v1599_v50  ;;  %v1473_v16 = vadd.f32 1.0, %v2446_v23  ;;  %v1313_v60 = vsub.f32 0.0, %v3557_v36  ;;  %v2623_v50 = vld [vmem:[%s2958_s16 + $0x178] sm:$0xff] }
 0x1f6   : > { %v1694_v30 = vadd.f32 %v2617_v18, %v1630_v62  ;;  %v1600_v43 = vmul.f32 %v2448_v15, %v3520_v54  ;;  %2453 = vpow2.f32 %v1362_v14 }
 0x1f7   : > { %v2450_v7 = vpop.eup %2449  ;;  %1727 = vst [vmem:[%s3279_s27 + $0x68] sm:$0xff] %v1663_v13  ;;  %2455 = vrcp.f32 %v1473_v16  ;;  %v1424_v4 = vmul.f32 1.442695, %v1313_v60  ;;  %v1148_v63 = vpop.f32.mrf.mxu1 }
 0x1f8   : > { %v2452_v27 = vpop.eup %2451  ;;  %1758 = vst [vmem:[%s3279_s27 + $0x160] sm:$0xff] %v1694_v30  ;;  %v1664_v28 = vadd.f32 %v2618_v56, %v1600_v43  ;;  %v1504_v6 = vadd.f32 1.0, %v2450_v7  ;;  %v3568_v35 = vadd.f32 %v3491_v26, %v1148_v63  ;;  %v2624_v43 = vld [vmem:[%s2958_s16 + $0x88] sm:$0xff] }
 0x1f9   : > { %v1631_v37 = vmul.f32 %v2452_v27, %v3526_v3  ;;  %2457 = vpow2.f32 %v1424_v4 }
 0x1fa   : > { %1728 = vst [vmem:[%s3279_s27 + $0x70] sm:$0xff] %v1664_v28  ;;  %2459 = vrcp.f32 %v1504_v6  ;;  %v1283_v54 = vsub.f32 0.0, %v3568_v35  ;;  %v1226_v33 = vpop.f32.mrf.mxu3  ;;  %v2625_v28 = vld [vmem:[%s2958_s16 + $0x180] sm:$0xff] }
 0x1fb   : > { %v1695_v32 = vadd.f32 %v2619_v12, %v1631_v37  ;;  %v3575_v41 = vadd.f32 %v3491_v26, %v1226_v33 }
 0x1fc   : > { %v2454_v29 = vpop.eup %2453  ;;  %v1364_v46 = vmul.f32 1.442695, %v1283_v54 }
 0x1fd   : > { %v2456_v9 = vpop.eup %2455  ;;  %1759 = vst [vmem:[%s3279_s27 + $0x168] sm:$0xff] %v1695_v32  ;;  %v1474_v49 = vadd.f32 1.0, %v2454_v29  ;;  %v1314_v3 = vsub.f32 0.0, %v3575_v41 }
 0x1fe   : > { %v1601_v45 = vmul.f32 %v2456_v9, %v3537_v40  ;;  %2461 = vpow2.f32 %v1364_v46 }
 0x1ff   : > { %v2458_v21 = vpop.eup %2457  ;;  %2463 = vrcp.f32 %v1474_v49  ;;  %v1426_v17 = vmul.f32 1.442695, %v1314_v3  ;;  %v1151_v39 = vpop.f32.mrf.mxu1  ;;  %v2626_v3 = vld [vmem:[%s2958_s16 + $0x90] sm:$0xff] }
 0x200   : > { %v2460_v2 = vpop.eup %2459  ;;  %v1665_v22 = vadd.f32 %v2620_v24, %v1601_v45  ;;  %v1505_v42 = vadd.f32 1.0, %v2458_v21  ;;  %v3582_v0 = vadd.f32 %v3491_v26, %v1151_v39 }
 0x201   : > { %v1632_v31 = vmul.f32 %v2460_v2, %v3546_v59  ;;  %2465 = vpow2.f32 %v1426_v17 }
 0x202   : > { %1729 = vst [vmem:[%s3279_s27 + $0x78] sm:$0xff] %v1665_v22  ;;  %2467 = vrcp.f32 %v1505_v42  ;;  %v1284_v40 = vsub.f32 0.0, %v3582_v0  ;;  %v1228_v51 = vpop.f32.mrf.mxu3  ;;  %v2627_v22 = vld [vmem:[%s2958_s16 + $0x188] sm:$0xff] }
 0x203   : > { %v1696_v53 = vadd.f32 %v2621_v25, %v1632_v31  ;;  %v3589_v11 = vadd.f32 %v3491_v26, %v1228_v51 }
 0x204   : > { %v2462_v47 = vpop.eup %2461  ;;  %v1366_v20 = vmul.f32 1.442695, %v1284_v40 }
 0x205   : > { %v2464_v34 = vpop.eup %2463  ;;  %1760 = vst [vmem:[%s3279_s27 + $0x170] sm:$0xff] %v1696_v53  ;;  %v1475_v19 = vadd.f32 1.0, %v2462_v47  ;;  %v1315_v59 = vsub.f32 0.0, %v3589_v11 }
 0x206   : > { %v1602_v58 = vmul.f32 %v2464_v34, %v3552_v61  ;;  %2469 = vpow2.f32 %v1366_v20 }
 0x207   : > { %v2466_v57 = vpop.eup %2465  ;;  %2471 = vrcp.f32 %v1475_v19  ;;  %v1428_v38 = vmul.f32 1.442695, %v1315_v59  ;;  %v1153_v5 = vpop.f32.mrf.mxu1  ;;  %v2628_v19 = vld [vmem:[%s2958_s16 + $0x98] sm:$0xff] }
 0x208   : > { %v2468_v52 = vpop.eup %2467  ;;  %v1666_v48 = vadd.f32 %v2622_v44, %v1602_v58  ;;  %v1506_v8 = vadd.f32 1.0, %v2466_v57  ;;  %v3596_v10 = vadd.f32 %v3491_v26, %v1153_v5 }
 0x209   : > { %v1633_v55 = vmul.f32 %v2468_v52, %v3557_v36  ;;  %2473 = vpow2.f32 %v1428_v38 }
 0x20a   : > { %1730 = vst [vmem:[%s3279_s27 + $0x80] sm:$0xff] %v1666_v48  ;;  %2475 = vrcp.f32 %v1506_v8  ;;  %v1285_v61 = vsub.f32 0.0, %v3596_v10 }
 0x20b   : > { %v1697_v23 = vadd.f32 %v2623_v50, %v1633_v55  ;;  %v1231_v62 = vpop.f32.mrf.mxu3  ;;  %v2629_v55 = vld [vmem:[%s2958_s16 + $0x190] sm:$0xff] }
 0x20c   : > { %v2470_v14 = vpop.eup %2469  ;;  %v1368_v15 = vmul.f32 1.442695, %v1285_v61  ;;  %v3603_v1 = vadd.f32 %v3491_v26, %v1231_v62 }
 0x20d   : > { %v2472_v13 = vpop.eup %2471  ;;  %1761 = vst [vmem:[%s3279_s27 + $0x178] sm:$0xff] %v1697_v23  ;;  %v1476_v16 = vadd.f32 1.0, %v2470_v14 }
 0x20e   : > { %v1603_v36 = vmul.f32 %v2472_v13, %v3568_v35  ;;  %2477 = vpow2.f32 %v1368_v15  ;;  %v1316_v60 = vsub.f32 0.0, %v3603_v1 }
 0x20f   : > { %v2474_v18 = vpop.eup %2473  ;;  %2479 = vrcp.f32 %v1476_v16  ;;  %v1156_v56 = vpop.f32.mrf.mxu1 }
 0x210   : > { %v2476_v30 = vpop.eup %2475  ;;  %v1667_v7 = vadd.f32 %v2624_v43, %v1603_v36  ;;  %v1507_v4 = vadd.f32 1.0, %v2474_v18  ;;  %v1430_v63 = vmul.f32 1.442695, %v1316_v60  ;;  %v3613_v35 = vadd.f32 %v3491_v26, %v1156_v56  ;;  %v2630_v43 = vld [vmem:[%s2958_s16 + $0xa0] sm:$0xff] }
 0x211   : > { %v1634_v27 = vmul.f32 %v2476_v30, %v3575_v41 }
 0x212   : > { %1731 = vst [vmem:[%s3279_s27 + $0x88] sm:$0xff] %v1667_v7  ;;  %2481 = vrcp.f32 %v1507_v4  ;;  %v1286_v41 = vsub.f32 0.0, %v3613_v35 }
 0x213   : > { %v1698_v6 = vadd.f32 %v2625_v28, %v1634_v27  ;;  %2483 = vpow2.f32 %v1430_v63  ;;  %v1233_v37 = vpop.f32.mrf.mxu3  ;;  %v2631_v27 = vld [vmem:[%s2958_s16 + $0x198] sm:$0xff] }
 0x214   : > { %v2478_v54 = vpop.eup %2477  ;;  %v3616_v33 = vadd.f32 %v3491_v26, %v1233_v37  ;;  %v1370_v9 = vmul.f32 1.442695, %v1286_v41 }
 0x215   : > { %v2480_v12 = vpop.eup %2479  ;;  %1762 = vst [vmem:[%s3279_s27 + $0x180] sm:$0xff] %v1698_v6  ;;  %v1477_v32 = vadd.f32 1.0, %v2478_v54 }
 0x216   : > { %v1604_v29 = vmul.f32 %v2480_v12, %v3582_v0  ;;  %v1317_v46 = vsub.f32 0.0, %v3616_v33 }
 0x217   : > { %2485 = vrcp.f32 %v1477_v32  ;;  %v1158_v24 = vpop.f32.mrf.mxu1 }
 0x218   : > { %v2482_v49 = vpop.eup %2481  ;;  %v1668_v45 = vadd.f32 %v2626_v3, %v1604_v29  ;;  %v1432_v21 = vmul.f32 1.442695, %v1317_v46  ;;  %2487 = vpow2.f32 %v1370_v9  ;;  %v3627_v0 = vadd.f32 %v3491_v26, %v1158_v24  ;;  %v2632_v3 = vld [vmem:[%s2958_s16 + $0xa8] sm:$0xff]  ;;  %v2633_v24 = vld [vmem:[%s2958_s16 + $0x1a0] sm:$0xff] }
 0x219   : > { %v2484_v17 = vpop.eup %2483  ;;  %v1635_v39 = vmul.f32 %v2482_v49, %v3589_v11 }
 0x21a   : > { %1732 = vst [vmem:[%s3279_s27 + $0x90] sm:$0xff] %v1668_v45  ;;  %v1508_v2 = vadd.f32 1.0, %v2484_v17  ;;  %2489 = vpow2.f32 %v1432_v21  ;;  %v1287_v25 = vsub.f32 0.0, %v3627_v0 }
 0x21b   : > { %v1699_v42 = vadd.f32 %v2627_v22, %v1635_v39  ;;  %v1236_v31 = vpop.f32.mrf.mxu3 }
 0x21c   : > { %2491 = vrcp.f32 %v1508_v2  ;;  %v3630_v40 = vadd.f32 %v3491_v26, %v1236_v31  ;;  %v1372_v20 = vmul.f32 1.442695, %v1287_v25 }
 0x21d   : > { %v2486_v51 = vpop.eup %2485  ;;  %1763 = vst [vmem:[%s3279_s27 + $0x188] sm:$0xff] %v1699_v42 }
 0x21e   : > { %v1605_v53 = vmul.f32 %v2486_v51, %v3596_v10  ;;  %v1318_v11 = vsub.f32 0.0, %v3630_v40  ;;  %v2488_v47 = vpop.eup %2487  ;;  %2493 = vpow2.f32 %v1372_v20 }
 0x21f   : > { %v1478_v58 = vadd.f32 1.0, %v2488_v47 }
 0x220   : > { %v2490_v34 = vpop.eup %2489  ;;  %v1669_v59 = vadd.f32 %v2628_v19, %v1605_v53  ;;  %v1434_v57 = vmul.f32 1.442695, %v1318_v11 }
 0x221   : > { %v1509_v38 = vadd.f32 1.0, %v2490_v34  ;;  %2495 = vrcp.f32 %v1478_v58  ;;  %v1161_v52 = vpop.f32.mrf.mxu1  ;;  %v2634_v34 = vld [vmem:[%s2958_s16 + $0xb0] sm:$0xff] }
 0x222   : > { %v2492_v5 = vpop.eup %2491  ;;  %1733 = vst [vmem:[%s3279_s27 + $0x98] sm:$0xff] %v1669_v59  ;;  %v3640_v48 = vadd.f32 %v3491_v26, %v1161_v52 }
 0x223   : > { %v1636_v44 = vmul.f32 %v2492_v5, %v3603_v1  ;;  %2497 = vrcp.f32 %v1509_v38  ;;  %v1238_v8 = vpop.f32.mrf.mxu3  ;;  %v2635_v5 = vld [vmem:[%s2958_s16 + $0x1a8] sm:$0xff] }
 0x224   : > { %2499 = vpow2.f32 %v1434_v57  ;;  %v3643_v10 = vadd.f32 %v3491_v26, %v1238_v8  ;;  %v1288_v50 = vsub.f32 0.0, %v3640_v48  ;;  %v2494_v62 = vpop.eup %2493 }
 0x225   : > { %v1700_v61 = vadd.f32 %v2629_v55, %v1636_v44  ;;  %v1479_v1 = vadd.f32 1.0, %v2494_v62 }
 0x226   : > { %v1319_v23 = vsub.f32 0.0, %v3643_v10  ;;  %v1374_v14 = vmul.f32 1.442695, %v1288_v50 }
 0x227   : > { %1764 = vst [vmem:[%s3279_s27 + $0x190] sm:$0xff] %v1700_v61  ;;  %v2496_v15 = vpop.eup %2495 }
 0x228   : > { %v1436_v13 = vmul.f32 1.442695, %v1319_v23  ;;  %v1606_v36 = vmul.f32 %v2496_v15, %v3613_v35  ;;  %2501 = vpow2.f32 %v1374_v14  ;;  %v2636_v14 = vld [vmem:[%s2958_s16 + $0xb8] sm:$0xff] }
 0x229   : > { %v2498_v16 = vpop.eup %2497  ;;  %2503 = vrcp.f32 %v1479_v1  ;;  %v1163_v30 = vpop.f32.mrf.mxu1 }
 0x22a   : > { %v2500_v60 = vpop.eup %2499  ;;  %v1637_v18 = vmul.f32 %v2498_v16, %v3616_v33  ;;  %v1670_v7 = vadd.f32 %v2630_v43, %v1606_v36  ;;  %2505 = vpow2.f32 %v1436_v13  ;;  %v3653_v63 = vadd.f32 %v3491_v26, %v1163_v30 }
 0x22b   : > { %v1510_v4 = vadd.f32 1.0, %v2500_v60 }
 0x22c   : > { %v1701_v56 = vadd.f32 %v2631_v27, %v1637_v18  ;;  %1734 = vst [vmem:[%s3279_s27 + $0xa0] sm:$0xff] %v1670_v7  ;;  %v1289_v28 = vsub.f32 0.0, %v3653_v63  ;;  %v2637_v27 = vld [vmem:[%s2958_s16 + $0x1b0] sm:$0xff] }
 0x22d   : > { %2507 = vrcp.f32 %v1510_v4 }
 0x22e   : > { %1765 = vst [vmem:[%s3279_s27 + $0x198] sm:$0xff] %v1701_v56  ;;  %v2502_v6 = vpop.eup %2501  ;;  %v1376_v35 = vmul.f32 1.442695, %v1289_v28 }
 0x22f   : > { %v1241_v37 = vpop.f32.mrf.mxu3  ;;  %v2504_v54 = vpop.eup %2503  ;;  %v1480_v33 = vadd.f32 1.0, %v2502_v6 }
 0x230   : > { %v3660_v12 = vadd.f32 %v3491_v26, %v1241_v37  ;;  %v2506_v32 = vpop.eup %2505  ;;  %v1607_v41 = vmul.f32 %v2504_v54, %v3627_v0  ;;  %2509 = vpow2.f32 %v1376_v35 }
 0x231   : > { %2511 = vrcp.f32 %v1480_v33  ;;  %v1511_v29 = vadd.f32 1.0, %v2506_v32  ;;  %v2638_v33 = vld [vmem:[%s2958_s16 + $0xc0] sm:$0xff] }
 0x232   : > { %v1320_v46 = vsub.f32 0.0, %v3660_v12  ;;  %v1166_v9 = vpop.f32.mrf.mxu1  ;;  %v1671_v45 = vadd.f32 %v2632_v3, %v1607_v41 }
 0x233   : > { %v2508_v49 = vpop.eup %2507  ;;  %v3666_v21 = vadd.f32 %v3491_v26, %v1166_v9  ;;  %2513 = vrcp.f32 %v1511_v29 }
 0x234   : > { %v1638_v17 = vmul.f32 %v2508_v49, %v3630_v40  ;;  %v1438_v39 = vmul.f32 1.442695, %v1320_v46  ;;  %1735 = vst [vmem:[%s3279_s27 + $0xa8] sm:$0xff] %v1671_v45 }
 0x235   : > { %v1290_v2 = vsub.f32 0.0, %v3666_v21 }
 0x236   : > { %v1702_v22 = vadd.f32 %v2633_v24, %v1638_v17  ;;  %2515 = vpow2.f32 %v1438_v39  ;;  %v2510_v42 = vpop.eup %2509  ;;  %v2639_v39 = vld [vmem:[%s2958_s16 + $0x1b8] sm:$0xff] }
 0x237   : > { %v1378_v0 = vmul.f32 1.442695, %v1290_v2  ;;  %v1243_v31 = vpop.f32.mrf.mxu3  ;;  %v2512_v51 = vpop.eup %2511  ;;  %v1481_v25 = vadd.f32 1.0, %v2510_v42 }
 0x238   : > { %1766 = vst [vmem:[%s3279_s27 + $0x1a0] sm:$0xff] %v1702_v22  ;;  %v3674_v53 = vadd.f32 %v3491_v26, %v1243_v31  ;;  %v1608_v40 = vmul.f32 %v2512_v51, %v3640_v48 }
 0x239   : > { %2517 = vpow2.f32 %v1378_v0  ;;  %v2514_v11 = vpop.eup %2513 }
 0x23a   : > { %2519 = vrcp.f32 %v1481_v25  ;;  %v1321_v47 = vsub.f32 0.0, %v3674_v53  ;;  %v1168_v20 = vpop.f32.mrf.mxu1  ;;  %v1672_v19 = vadd.f32 %v2634_v34, %v1608_v40  ;;  %v1639_v59 = vmul.f32 %v2514_v11, %v3643_v10  ;;  %v2640_v25 = vld [vmem:[%s2958_s16 + $0xc8] sm:$0xff] }
 0x23b   : > { %v3681_v58 = vadd.f32 %v3491_v26, %v1168_v20 }
 0x23c   : > { %v2516_v57 = vpop.eup %2515  ;;  %v1440_v38 = vmul.f32 1.442695, %v1321_v47  ;;  %1736 = vst [vmem:[%s3279_s27 + $0xb0] sm:$0xff] %v1672_v19  ;;  %v1703_v52 = vadd.f32 %v2635_v5, %v1639_v59 }
 0x23d   : > { %v1512_v44 = vadd.f32 1.0, %v2516_v57  ;;  %v1291_v48 = vsub.f32 0.0, %v3681_v58 }
 0x23e   : > { %2521 = vpow2.f32 %v1440_v38  ;;  %1767 = vst [vmem:[%s3279_s27 + $0x1a8] sm:$0xff] %v1703_v52 }
 0x23f   : > { %v2518_v8 = vpop.eup %2517  ;;  %2523 = vrcp.f32 %v1512_v44  ;;  %v1380_v55 = vmul.f32 1.442695, %v1291_v48  ;;  %v1246_v50 = vpop.f32.mrf.mxu3 }
 0x240   : > { %v2520_v61 = vpop.eup %2519  ;;  %v1482_v10 = vadd.f32 1.0, %v2518_v8  ;;  %v3689_v62 = vadd.f32 %v3491_v26, %v1246_v50 }
 0x241   : > { %v1609_v23 = vmul.f32 %v2520_v61, %v3653_v63  ;;  %2525 = vpow2.f32 %v1380_v55  ;;  %v2641_v55 = vld [vmem:[%s2958_s16 + $0x1c0] sm:$0xff] }
 0x242   : > { %2527 = vrcp.f32 %v1482_v10  ;;  %v1322_v1 = vsub.f32 0.0, %v3689_v62 }
 0x243   : > { %v1673_v15 = vadd.f32 %v2636_v14, %v1609_v23  ;;  %v1171_v13 = vpop.f32.mrf.mxu1  ;;  %v2642_v14 = vld [vmem:[%s2958_s16 + $0xd0] sm:$0xff] }
 0x244   : > { %v2522_v16 = vpop.eup %2521  ;;  %v3694_v36 = vadd.f32 %v3491_v26, %v1171_v13  ;;  %v1442_v30 = vmul.f32 1.442695, %v1322_v1 }
 0x245   : > { %v2524_v60 = vpop.eup %2523  ;;  %1737 = vst [vmem:[%s3279_s27 + $0xb8] sm:$0xff] %v1673_v15  ;;  %v1513_v18 = vadd.f32 1.0, %v2522_v16 }
 0x246   : > { %v1640_v43 = vmul.f32 %v2524_v60, %v3660_v12  ;;  %v1292_v7 = vsub.f32 0.0, %v3694_v36 }
 0x247   : > { %v2526_v4 = vpop.eup %2525  ;;  %2529 = vrcp.f32 %v1513_v18  ;;  %v1248_v35 = vpop.f32.mrf.mxu3 }
 0x248   : > { %v2528_v63 = vpop.eup %2527  ;;  %v1704_v56 = vadd.f32 %v2637_v27, %v1640_v43  ;;  %v1483_v28 = vadd.f32 1.0, %v2526_v4  ;;  %2531 = vpow2.f32 %v1442_v30  ;;  %v1382_v6 = vmul.f32 1.442695, %v1292_v7  ;;  %v2643_v7 = vld [vmem:[%s2958_s16 + $0x1c8] sm:$0xff] }
 0x249   : > { %v1610_v37 = vmul.f32 %v2528_v63, %v3666_v21  ;;  %v3702_v54 = vadd.f32 %v3491_v26, %v1248_v35 }
 0x24a   : > { %1768 = vst [vmem:[%s3279_s27 + $0x1b0] sm:$0xff] %v1704_v56  ;;  %2533 = vrcp.f32 %v1483_v28 }
 0x24b   : > { %v1674_v12 = vadd.f32 %v2638_v33, %v1610_v37  ;;  %2535 = vpow2.f32 %v1382_v6  ;;  %v1323_v32 = vsub.f32 0.0, %v3702_v54  ;;  %v1173_v41 = vpop.f32.mrf.mxu1  ;;  %v2644_v37 = vld [vmem:[%s2958_s16 + $0xd8] sm:$0xff] }
 0x24c   : > { %v3708_v29 = vadd.f32 %v3491_v26, %v1173_v41 }
 0x24d   : > { %v2530_v46 = vpop.eup %2529  ;;  %1738 = vst [vmem:[%s3279_s27 + $0xc0] sm:$0xff] %v1674_v12  ;;  %v1444_v9 = vmul.f32 1.442695, %v1323_v32 }
 0x24e   : > { %v2532_v49 = vpop.eup %2531  ;;  %v1641_v3 = vmul.f32 %v2530_v46, %v3674_v53  ;;  %v1293_v45 = vsub.f32 0.0, %v3708_v29 }
 0x24f   : > { %v1514_v21 = vadd.f32 1.0, %v2532_v49  ;;  %2537 = vpow2.f32 %v1444_v9  ;;  %v1251_v22 = vpop.f32.mrf.mxu3 }
 0x250   : > { %v2534_v17 = vpop.eup %2533  ;;  %v1705_v2 = vadd.f32 %v2639_v39, %v1641_v3  ;;  %v1384_v24 = vmul.f32 1.442695, %v1293_v45  ;;  %v3716_v31 = vadd.f32 %v3491_v26, %v1251_v22 }
 0x251   : > { %v2536_v42 = vpop.eup %2535  ;;  %v1611_v0 = vmul.f32 %v2534_v17, %v3681_v58  ;;  %2539 = vrcp.f32 %v1514_v21  ;;  %v2645_v21 = vld [vmem:[%s2958_s16 + $0x1d0] sm:$0xff] }
 0x252   : > { %1769 = vst [vmem:[%s3279_s27 + $0x1b8] sm:$0xff] %v1705_v2  ;;  %v1484_v51 = vadd.f32 1.0, %v2536_v42  ;;  %2541 = vpow2.f32 %v1384_v24  ;;  %v1324_v40 = vsub.f32 0.0, %v3716_v31 }
 0x253   : > { %v1675_v53 = vadd.f32 %v2640_v25, %v1611_v0 }
 0x254   : > { %2543 = vrcp.f32 %v1484_v51  ;;  %v1176_v11 = vpop.f32.mrf.mxu1  ;;  %v1446_v20 = vmul.f32 1.442695, %v1324_v40 }
 0x255   : > { %v2538_v47 = vpop.eup %2537  ;;  %1739 = vst [vmem:[%s3279_s27 + $0xc8] sm:$0xff] %v1675_v53  ;;  %v3723_v34 = vadd.f32 %v3491_v26, %v1176_v11  ;;  %v2646_v11 = vld [vmem:[%s2958_s16 + $0xe0] sm:$0xff] }
 0x256   : > { %v1515_v19 = vadd.f32 1.0, %v2538_v47  ;;  %2545 = vpow2.f32 %v1446_v20 }
 0x257   : > { %v2540_v59 = vpop.eup %2539  ;;  %v1294_v58 = vsub.f32 0.0, %v3723_v34  ;;  %v1253_v5 = vpop.f32.mrf.mxu3 }
 0x258   : > { %v2542_v57 = vpop.eup %2541  ;;  %v1642_v38 = vmul.f32 %v2540_v59, %v3689_v62  ;;  %2547 = vrcp.f32 %v1515_v19  ;;  %v3728_v48 = vadd.f32 %v3491_v26, %v1253_v5 }
 0x259   : > { %v1485_v52 = vadd.f32 1.0, %v2542_v57  ;;  %v1386_v44 = vmul.f32 1.442695, %v1294_v58  ;;  %v2647_v57 = vld [vmem:[%s2958_s16 + $0x1d8] sm:$0xff] }
 0x25a   : > { %v2544_v8 = vpop.eup %2543  ;;  %v1706_v61 = vadd.f32 %v2641_v55, %v1642_v38  ;;  %v1325_v50 = vsub.f32 0.0, %v3728_v48 }
 0x25b   : > { %v1612_v10 = vmul.f32 %v2544_v8, %v3694_v36  ;;  %2549 = vrcp.f32 %v1485_v52 }
 0x25c   : > { %1770 = vst [vmem:[%s3279_s27 + $0x1c0] sm:$0xff] %v1706_v61  ;;  %2551 = vpow2.f32 %v1386_v44  ;;  %v1178_v23 = vpop.f32.mrf.mxu1  ;;  %v2546_v62 = vpop.eup %2545  ;;  %v1448_v1 = vmul.f32 1.442695, %v1325_v50 }
 0x25d   : > { %v1676_v15 = vadd.f32 %v2642_v14, %v1612_v10  ;;  %v3736_v13 = vadd.f32 %v3491_v26, %v1178_v23  ;;  %v1516_v60 = vadd.f32 1.0, %v2546_v62  ;;  %v2648_v10 = vld [vmem:[%s2958_s16 + $0xe8] sm:$0xff] }
 0x25e   : > { %v2548_v16 = vpop.eup %2547  ;;  %2553 = vpow2.f32 %v1448_v1 }
 0x25f   : > { %1740 = vst [vmem:[%s3279_s27 + $0xd0] sm:$0xff] %v1676_v15  ;;  %v1643_v36 = vmul.f32 %v2548_v16, %v3702_v54  ;;  %v1295_v18 = vsub.f32 0.0, %v3736_v13  ;;  %2555 = vrcp.f32 %v1516_v60  ;;  %v1256_v30 = vpop.f32.mrf.mxu3  ;;  %v2650_v60 = vld [vmem:[%s3828_s4] ss:$0 sm:$0xff] }
 0x260   : > { %v3743_v27 = vadd.f32 %v3491_v26, %v1256_v30 }
 0x261   : > { %v2550_v43 = vpop.eup %2549  ;;  %v1707_v4 = vadd.f32 %v2643_v7, %v1643_v36  ;;  %v1388_v63 = vmul.f32 1.442695, %v1295_v18 }
 0x262   : > { %v2552_v56 = vpop.eup %2551  ;;  %v1613_v28 = vmul.f32 %v2550_v43, %v3708_v29  ;;  %v1326_v35 = vsub.f32 0.0, %v3743_v27 }
 0x263   : > { %1771 = vst [vmem:[%s3279_s27 + $0x1c8] sm:$0xff] %v1707_v4  ;;  %v1486_v6 = vadd.f32 1.0, %v2552_v56  ;;  %2557 = vpow2.f32 %v1388_v63  ;;  %v2651_v63 = vld [vmem:[%s2958_s16 + $0xf0] sm:$0xff] }
 0x264   : > { %v1677_v54 = vadd.f32 %v2644_v37, %v1613_v28  ;;  %v1181_v33 = vpop.f32.mrf.mxu1  ;;  %v2554_v12 = vpop.eup %2553  ;;  %v1450_v32 = vmul.f32 1.442695, %v1326_v35  ;;  %v2652_v37 = vld [vmem:[%s2958_s16 + $0x1e8] sm:$0xff] }
 0x265   : > { %2559 = vrcp.f32 %v1486_v6  ;;  %v3750_v41 = vadd.f32 %v3491_v26, %v1181_v33  ;;  %v2556_v46 = vpop.eup %2555  ;;  %v1517_v9 = vadd.f32 1.0, %v2554_v12 }
 0x266   : > { %1741 = vst [vmem:[%s3279_s27 + $0xd8] sm:$0xff] %v1677_v54  ;;  %v1644_v29 = vmul.f32 %v2556_v46, %v3716_v31  ;;  %2561 = vpow2.f32 %v1450_v32 }
 0x267   : > { %v1296_v49 = vsub.f32 0.0, %v3750_v41  ;;  %2563 = vrcp.f32 %v1517_v9  ;;  %v1258_v3 = vpop.f32.mrf.mxu3 }
 0x268   : > { %v1708_v17 = vadd.f32 %v2645_v21, %v1644_v29  ;;  %v3757_v2 = vadd.f32 %v3491_v26, %v1258_v3  ;;  %v2654_v3 = vld [vmem:[%s2958_s16 + $0x1f0] sm:$0xff] }
 0x269   : > { %v2558_v45 = vpop.eup %2557  ;;  %v1390_v39 = vmul.f32 1.442695, %v1296_v49 }
 0x26a   : > { %v1487_v24 = vadd.f32 1.0, %v2558_v45  ;;  %1772 = vst [vmem:[%s3279_s27 + $0x1d0] sm:$0xff] %v1708_v17  ;;  %v1327_v42 = vsub.f32 0.0, %v3757_v2 }
 0x26b   : > { %v2560_v22 = vpop.eup %2559  ;;  %2565 = vpow2.f32 %v1390_v39  ;;  %v2655_v39 = vld [vmem:[%s2958_s16 + $0x1f8] sm:$0xff] }
 0x26c   : > { %v1614_v0 = vmul.f32 %v2560_v22, %v3723_v34  ;;  %2567 = vrcp.f32 %v1487_v24  ;;  %v1183_v31 = vpop.f32.mrf.mxu1  ;;  %v2562_v51 = vpop.eup %2561  ;;  %v1452_v25 = vmul.f32 1.442695, %v1327_v42 }
 0x26d   : > { %v1184_v53 = vadd.f32 %v3491_v26, %v1183_v31  ;;  %v2564_v40 = vpop.eup %2563  ;;  %v1518_v20 = vadd.f32 1.0, %v2562_v51 }
 0x26e   : > { %v1678_v47 = vadd.f32 %v2646_v11, %v1614_v0  ;;  %v1645_v19 = vmul.f32 %v2564_v40, %v3728_v48  ;;  %2569 = vpow2.f32 %v1452_v25 }
 0x26f   : > { %v1297_v59 = vsub.f32 0.0, %v1184_v53  ;;  %2571 = vrcp.f32 %v1518_v20  ;;  %v1261_v34 = vpop.f32.mrf.mxu3 }
 0x270   : > { %1742 = vst [vmem:[%s3279_s27 + $0xe0] sm:$0xff] %v1678_v47  ;;  %v1709_v38 = vadd.f32 %v2647_v57, %v1645_v19  ;;  %v1262_v52 = vadd.f32 %v3491_v26, %v1261_v34 }
 0x271   : > { %v2566_v58 = vpop.eup %2565  ;;  %v1392_v5 = vmul.f32 1.442695, %v1297_v59 }
 0x272   : > { %v2568_v44 = vpop.eup %2567  ;;  %v1488_v8 = vadd.f32 1.0, %v2566_v58  ;;  %1773 = vst [vmem:[%s3279_s27 + $0x1d8] sm:$0xff] %v1709_v38  ;;  %v1328_v48 = vsub.f32 0.0, %v1262_v52 }
 0x273   : > { %v1615_v55 = vmul.f32 %v2568_v44, %v3736_v13  ;;  %2573 = vpow2.f32 %v1392_v5  ;;  %v2649_v13 = vld [vmem:[%s2958_s16 + $0x1e0] sm:$0xff] }
 0x274   : > { %2575 = vrcp.f32 %v1488_v8  ;;  %v2570_v61 = vpop.eup %2569  ;;  %v1454_v23 = vmul.f32 1.442695, %v1328_v48 }
 0x275   : > { %v1679_v50 = vadd.f32 %v2648_v10, %v1615_v55  ;;  %v2572_v62 = vpop.eup %2571  ;;  %v1519_v14 = vadd.f32 1.0, %v2570_v61 }
 0x276   : > { %v1646_v15 = vmul.f32 %v2572_v62, %v3743_v27  ;;  %2577 = vpow2.f32 %v1454_v23 }
 0x277   : > { %1743 = vst [vmem:[%s3279_s27 + $0xe8] sm:$0xff] %v1679_v50  ;;  %2579 = vrcp.f32 %v1519_v14  ;;  %v1263_v26 = vpop.f32.mrf.mxu3 }
 0x278   : > { %v1710_v16 = vadd.f32 %v2649_v13, %v1646_v15  ;;  %v1264_v36 = vadd.f32 %v2650_v60, %v1263_v26 }
 0x279   : > { %v2574_v1 = vpop.eup %2573 }
 0x27a   : > { %v2576_v18 = vpop.eup %2575  ;;  %v1489_v30 = vadd.f32 1.0, %v2574_v1  ;;  %1774 = vst [vmem:[%s3279_s27 + $0x1e0] sm:$0xff] %v1710_v16  ;;  %v1329_v7 = vsub.f32 0.0, %v1264_v36 }
 0x27b   : > { %v1616_v43 = vmul.f32 %v2576_v18, %v3750_v41  ;;  %v2653_v41 = vld [vmem:[%s2958_s16 + $0xf8] sm:$0xff] }
 0x27c   : > { %2581 = vrcp.f32 %v1489_v30  ;;  %v2578_v4 = vpop.eup %2577  ;;  %v1456_v56 = vmul.f32 1.442695, %v1329_v7 }
 0x27d   : > { %v1680_v27 = vadd.f32 %v2651_v63, %v1616_v43  ;;  %v2580_v28 = vpop.eup %2579  ;;  %v1520_v6 = vadd.f32 1.0, %v2578_v4 }
 0x27e   : > { %v1647_v35 = vmul.f32 %v2580_v28, %v3757_v2  ;;  %2583 = vpow2.f32 %v1456_v56 }
 0x27f   : > { %1744 = vst [vmem:[%s3279_s27 + $0xf0] sm:$0xff] %v1680_v27  ;;  %2585 = vrcp.f32 %v1520_v6 }
 0x280   : > { %v1711_v54 = vadd.f32 %v2652_v37, %v1647_v35 }
 0x282   : > { %v2582_v33 = vpop.eup %2581  ;;  %1775 = vst [vmem:[%s3279_s27 + $0x1e8] sm:$0xff] %v1711_v54 }
 0x283   : > { %v1617_v12 = vmul.f32 %v2582_v33, %v1184_v53 }
 0x284   : > { %v2584_v32 = vpop.eup %2583 }
 0x285   : > { %v1681_v46 = vadd.f32 %v2653_v41, %v1617_v12  ;;  %v2586_v9 = vpop.eup %2585  ;;  %v1521_v29 = vadd.f32 1.0, %v2584_v32 }
 0x286   : > { %v1648_v49 = vmul.f32 %v2586_v9, %v1262_v52 }
 0x287   : > { %1745 = vst [vmem:[%s3279_s27 + $0xf8] sm:$0xff] %v1681_v46  ;;  %2587 = vrcp.f32 %v1521_v29 }
 0x288   : > { %v1712_v45 = vadd.f32 %v2654_v3, %v1648_v49 }
 0x28a   : > { %1776 = vst [vmem:[%s3279_s27 + $0x1f0] sm:$0xff] %v1712_v45 }
 0x28d   : > { %v2588_v21 = vpop.eup %2587 }
 0x28e   : > { %v1649_v17 = vmul.f32 %v2588_v21, %v1264_v36 }
 0x290   : > { %v1713_v2 = vadd.f32 %v2655_v39, %v1649_v17 }
 0x292   : > { %1777 = vst [vmem:[%s3279_s27 + $0x1f8] sm:$0xff] %v1713_v2 }
 0x293   : > { %2773 = shalt.err (!%p2770_p10)
}
 0x294   : > { %s2824_s8 = smov 128   ;;  %s2825_s16 = smov 8  }
 0x295   : > { %2012 = dma.vmem_to_hbm [thread:$0]  (%p2922_p3), %s1792_s29, 8192, %s1794_s9, %s1779_s10, %s2824_s8, %s2824_s8, %s2825_s16  }
 0x296 PF: > { %s1808_s27 = sand.u32 1, %s2804_s18   ;;  %p3835_p12 = scmp.ge.s32.totalorder %s2816_s21, 2 }
 0x297   : > { %s1809_s7 = scalar_lea.sflag [#allocation4], %s1808_s27 }
 0x298   : > { %p2026_p13 = pnand %p3835_p12, %p2891_p6 }
 0x29a   : > { %p2027_p0 = pneg %p2026_p13 }
 0x29c   : > { %2799 = dma.done.wait (%p2027_p0), %s1809_s7, 8192  }
 0x29d   : > { %2801 = vsyncadd (%p2027_p0), %s1809_s7, 4294959104  ;;  %p19_p5 = scmp.ge.s32.totalorder %s2912_s14, 4   ;;  %s3836_s18 = smov %s2808_s19 }
 0x29e   : > { %s3837_s19 = smov %s2812_s20  ;;  %s3838_s20 = smov %s2928_s23 }
 0x29f   : > { %s3839_s21 = smov %s2912_s14  ;;  %21 = sbr.rel (!%p19_p5) target bundleno = 6 (0x6), region = 93 }
 0x2a4   :  { %1815 = vsyncpa [#allocation3], 1 }
 0x2a5   :  { %1817 = vsyncpa [#allocation3 + $0x1], 1 }
 0x2a6   :  { %1818 = vsyncpa [#allocation6], 1 }
 0x2a7   :  { %1819 = vsyncpa [#allocation4], 1 }
 0x2a8   :  { %1821 = vsyncpa [#allocation4 + $0x1], 1 }

</bundles_post_ra>
